<compile_context>
chip_gen: v6e
topology: v6e:2x2x1
jax: 0.10.0
libtpu: 0.0.40
codegen_flags: <defaults>
</compile_context>

<pallas_src>
import functools

import jax
import jax.numpy as jnp
from jax import lax
from jax.experimental import pallas as pl
from jax.experimental.pallas import tpu as pltpu


DROP_P = 0.4
# keep element iff (hash & 0x7FFFFFFF) >= DROP_P * 2^31
_DROP_THRESH_31 = int(round(DROP_P * (1 << 31)))          # 858993459
_SALT_L1 = 0x1B873593
_SALT_L2 = 0x68E31DA4
_MUL1 = -2048144789                                        # 0x85EBCA6B as int32
_MUL2 = -1028477387                                        # 0xC2B2AE35 as int32


def _lshr32(h, k):
    """Logical right shift on int32 (arithmetic shift + mask of sign-extended bits)."""
    return (h >> k) & jnp.int32((1 << (32 - k)) - 1)


def _keep_mask(shape, row_base, seed, salt):
    """Deterministic per-element Bernoulli(keep=1-DROP_P) mask via fmix32 hash.

    Uses the *global* flat element index (global row, local col) so every batch
    tile and every layer gets an independent, reproducible mask.  All int32.
    """
    r = lax.broadcasted_iota(jnp.int32, shape, 0) + row_base
    c = lax.broadcasted_iota(jnp.int32, shape, 1)
    h = (r * jnp.int32(shape[1]) + c + jnp.int32(salt)) ^ seed
    # murmur3 fmix32 (int32 wraparound == uint32 bit pattern)
    h = h ^ _lshr32(h, 16)
    h = h * jnp.int32(_MUL1)
    h = h ^ _lshr32(h, 13)
    h = h * jnp.int32(_MUL2)
    h = h ^ _lshr32(h, 16)
    u31 = h & jnp.int32(0x7FFFFFFF)                        # uniform in [0, 2^31)
    return u31 >= jnp.int32(_DROP_THRESH_31)               # keep w.p. 1 - DROP_P


def mlp_kernel(seed_ref,                                   # scalar-prefetch (SMEM)
               x_ref, w1_ref, b1_ref, w2_ref, b2_ref, w3_ref, b3_ref,
               out_ref):
    tile_m = x_ref.shape[0]
    row_base = pl.program_id(0) * tile_m                   # global row offset of tile
    seed = seed_ref[0]

    # linear1 (bf16 MXU, f32 acc) + relu + dropout(0.4)  (1/0.6 folded into w2)
    h1 = jnp.dot(x_ref[...], w1_ref[...], preferred_element_type=jnp.float32)
    h1 = jnp.maximum(h1 + b1_ref[...], 0.0)
    h1 = jnp.where(_keep_mask(h1.shape, row_base, seed, _SALT_L1), h1, 0.0)

    # linear2 (bf16 MXU, f32 acc) + relu + dropout(0.4)  (1/0.6 folded into w3)
    h2 = jnp.dot(h1.astype(jnp.bfloat16), w2_ref[...],
                 preferred_element_type=jnp.float32)
    h2 = jnp.maximum(h2 + b2_ref[...], 0.0)
    h2 = jnp.where(_keep_mask(h2.shape, row_base, seed, _SALT_L2), h2, 0.0)

    # linear_out (N=1): VPU multiply + lane reduce instead of a 1-column MXU pass
    logits = jnp.sum(h2 * w3_ref[...], axis=-1, keepdims=True) + b3_ref[...]
    out_ref[...] = jax.nn.sigmoid(logits)


def _round_up(v, m):
    return ((v + m - 1) // m) * m


def neural_net_base(x, params, seed=0, tile_m=256):
    """x: (B, 1024) float32 -> (B, 1) float32 (training-mode dropout active)."""
    w1, b1, w2, b2, w3, b3 = params
    B, d_in = x.shape
    h1_dim = w1.shape[1]          # 512
    h2_dim = w2.shape[1]          # num_unit

    inv_keep = 1.0 / (1.0 - DROP_P)
    # bf16 weights/activations for the two MXU matmuls; dropout rescale folded in.
    x_bf = x.astype(jnp.bfloat16)
    w1_bf = w1.astype(jnp.bfloat16)
    w2_bf = (w2 * inv_keep).astype(jnp.bfloat16)
    w3_row = (w3.reshape(1, h2_dim) * inv_keep).astype(jnp.float32)
    b1_r = b1.reshape(1, h1_dim).astype(jnp.float32)
    b2_r = b2.reshape(1, h2_dim).astype(jnp.float32)
    b3_r = b3.reshape(1, 1).astype(jnp.float32)

    # Batch tiling: tile_m rows per grid step (multiple of 8 sublanes).
    tile_m = max(8, min(tile_m, _round_up(B, 8)))
    tile_m = _round_up(tile_m, 8)
    b_pad = _round_up(B, tile_m)
    if b_pad != B:
        x_bf = jnp.pad(x_bf, ((0, b_pad - B), (0, 0)))
    grid = (b_pad // tile_m,)

    seed_arr = jnp.array([seed], dtype=jnp.int32)

    grid_spec = pltpu.PrefetchScalarGridSpec(
        num_scalar_prefetch=1,
        grid=grid,
        in_specs=[
            pl.BlockSpec((tile_m, d_in), lambda i, s: (i, 0)),     # x tile
            pl.BlockSpec((d_in, h1_dim), lambda i, s: (0, 0)),     # w1 (resident)
            pl.BlockSpec((1, h1_dim), lambda i, s: (0, 0)),        # b1
            pl.BlockSpec((h1_dim, h2_dim), lambda i, s: (0, 0)),   # w2 (resident)
            pl.BlockSpec((1, h2_dim), lambda i, s: (0, 0)),        # b2
            pl.BlockSpec((1, h2_dim), lambda i, s: (0, 0)),        # w3 row
            pl.BlockSpec((1, 1), lambda i, s: (0, 0)),             # b3
        ],
        out_specs=pl.BlockSpec((tile_m, 1), lambda i, s: (i, 0)),
    )

    out = pl.pallas_call(
        mlp_kernel,
        out_shape=jax.ShapeDtypeStruct((b_pad, 1), jnp.float32),
        grid_spec=grid_spec,
        compiler_params=pltpu.CompilerParams(
            dimension_semantics=("parallel",),          # megacore on v7x
            vmem_limit_bytes=32 * 1024 * 1024,          # safe on v5e/v6e/v7x
        ),
    )(seed_arr, x_bf, w1_bf, b1_r, w2_bf, b2_r, w3_row, b3_r)

    return out[:B]


def init_params(key, num_unit):
    """Deterministic synthetic init (shapes match the nn.Linear layers)."""
    k1, k2, k3, k4, k5, k6 = jax.random.split(key, 6)

    def lin(kw, kb, fan_in, fan_out):
        bound = 1.0 / (fan_in ** 0.5)
        w = jax.random.uniform(kw, (fan_in, fan_out), jnp.float32, -bound, bound)
        b = jax.random.uniform(kb, (1, fan_out), jnp.float32, -bound, bound)
        return w, b

    w1, b1 = lin(k1, k2, 1024, 512)
    w2, b2 = lin(k3, k4, 512, num_unit)
    w3, b3 = lin(k5, k6, num_unit, 1)
    return (w1, b1, w2, b2, w3, b3)


if __name__ == "__main__":
    num_unit = 128   # num_heads is unused in the PyTorch forward
    batch = 8

    key = jax.random.PRNGKey(0)
    kx, kp = jax.random.split(key)
    x = jax.random.normal(kx, (batch, 1024), dtype=jnp.float32)
    params = init_params(kp, num_unit)

    out = neural_net_base(x, params, seed=0)
    out = jax.block_until_ready(out)

    assert out.shape == (batch, 1) and out.dtype == jnp.float32
    assert bool(jnp.all(jnp.isfinite(out)))
    assert bool(jnp.all((out >= 0.0) & (out <= 1.0)))
    print("KERNEL_OK")
</pallas_src>

<mosaic_0001>
module attributes {stable_mosaic.version = 11 : i64} {
  func.func @mlp_kernel(%arg0: i32, %arg1: memref<1xi32, #tpu.memory_space<smem>>, %arg2: memref<8x1024xbf16, #tpu.memory_space<vmem>>, %arg3: memref<1024x512xbf16, #tpu.memory_space<vmem>>, %arg4: memref<1x512xf32, #tpu.memory_space<vmem>>, %arg5: memref<512x128xbf16, #tpu.memory_space<vmem>>, %arg6: memref<1x128xf32, #tpu.memory_space<vmem>>, %arg7: memref<1x128xf32, #tpu.memory_space<vmem>>, %arg8: memref<1x1xf32, #tpu.memory_space<vmem>>, %arg9: memref<8x1xf32, #tpu.memory_space<vmem>>) attributes {dimension_semantics = [#tpu.dimension_semantics<parallel>], iteration_bounds = array<i64: 1>, scalar_prefetch = 1 : i64, scratch_operands = 0 : i64, tpu.core_type = #tpu.core_type<tc>, window_params = [{transform_indices = @transform_0, window_bounds = array<i64: 8, 1024>}, {pipeline_mode = #tpu.pipeline_mode<synchronous>, transform_indices = @transform_1, window_bounds = array<i64: 1024, 512>}, {pipeline_mode = #tpu.pipeline_mode<synchronous>, transform_indices = @transform_2, window_bounds = array<i64: 1, 512>}, {pipeline_mode = #tpu.pipeline_mode<synchronous>, transform_indices = @transform_3, window_bounds = array<i64: 512, 128>}, {pipeline_mode = #tpu.pipeline_mode<synchronous>, transform_indices = @transform_4, window_bounds = array<i64: 1, 128>}, {pipeline_mode = #tpu.pipeline_mode<synchronous>, transform_indices = @transform_5, window_bounds = array<i64: 1, 128>}, {pipeline_mode = #tpu.pipeline_mode<synchronous>, transform_indices = @transform_6, window_bounds = array<i64: 1, 1>}, {transform_indices = @transform_7, window_bounds = array<i64: 8, 1>}]} {
    %c8_i32 = arith.constant 8 : i32
    %0 = arith.muli %arg0, %c8_i32 : i32
    %c0 = arith.constant 0 : index
    %1 = memref.load %arg1[%c0] : memref<1xi32, #tpu.memory_space<smem>>
    %c0_0 = arith.constant 0 : index
    %c0_1 = arith.constant 0 : index
    %2 = vector.load %arg2[%c0_0, %c0_1] : memref<8x1024xbf16, #tpu.memory_space<vmem>>, vector<8x1024xbf16>
    %c0_2 = arith.constant 0 : index
    %c0_3 = arith.constant 0 : index
    %3 = vector.load %arg3[%c0_2, %c0_3] : memref<1024x512xbf16, #tpu.memory_space<vmem>>, vector<1024x512xbf16>
    %cst = arith.constant dense<0.000000e+00> : vector<8x512xf32>
    %4 = tpu.matmul %2, %3, %cst {dimension_numbers = #tpu.dot_dimension_numbers<[1], [0], [0], [1], [0, 0, 1, 1], [], []>} : vector<8x1024xbf16>, vector<1024x512xbf16>, vector<8x512xf32> -> vector<8x512xf32>
    %c0_4 = arith.constant 0 : index
    %c0_5 = arith.constant 0 : index
    %5 = vector.load %arg4[%c0_4, %c0_5] : memref<1x512xf32, #tpu.memory_space<vmem>>, vector<1x512xf32>
    %6 = vector.broadcast %5 : vector<1x512xf32> to vector<8x512xf32>
    %7 = arith.addf %4, %6 : vector<8x512xf32>
    %cst_6 = arith.constant 0.000000e+00 : f32
    %8 = vector.broadcast %cst_6 : f32 to vector<8x512xf32>
    %9 = arith.maximumf %7, %8 : vector<8x512xf32>
    %10 = tpu.iota {dimensions = array<i32: 0>} : vector<8x512xi32>
    %11 = vector.broadcast %0 : i32 to vector<8x512xi32>
    %12 = arith.addi %10, %11 : vector<8x512xi32>
    %13 = tpu.iota {dimensions = array<i32: 1>} : vector<8x512xi32>
    %c512_i32 = arith.constant 512 : i32
    %14 = vector.broadcast %c512_i32 : i32 to vector<8x512xi32>
    %15 = arith.muli %12, %14 : vector<8x512xi32>
    %16 = arith.addi %15, %13 : vector<8x512xi32>
    %c461845907_i32 = arith.constant 461845907 : i32
    %17 = vector.broadcast %c461845907_i32 : i32 to vector<8x512xi32>
    %18 = arith.addi %16, %17 : vector<8x512xi32>
    %19 = vector.broadcast %1 : i32 to vector<8x512xi32>
    %20 = arith.xori %18, %19 : vector<8x512xi32>
    %c16_i32 = arith.constant 16 : i32
    %21 = vector.broadcast %c16_i32 : i32 to vector<8x512xi32>
    %22 = arith.shrsi %20, %21 : vector<8x512xi32>
    %c65535_i32 = arith.constant 65535 : i32
    %23 = vector.broadcast %c65535_i32 : i32 to vector<8x512xi32>
    %24 = arith.andi %22, %23 : vector<8x512xi32>
    %25 = arith.xori %20, %24 : vector<8x512xi32>
    %c-2048144789_i32 = arith.constant -2048144789 : i32
    %26 = vector.broadcast %c-2048144789_i32 : i32 to vector<8x512xi32>
    %27 = arith.muli %25, %26 : vector<8x512xi32>
    %c13_i32 = arith.constant 13 : i32
    %28 = vector.broadcast %c13_i32 : i32 to vector<8x512xi32>
    %29 = arith.shrsi %27, %28 : vector<8x512xi32>
    %c524287_i32 = arith.constant 524287 : i32
    %30 = vector.broadcast %c524287_i32 : i32 to vector<8x512xi32>
    %31 = arith.andi %29, %30 : vector<8x512xi32>
    %32 = arith.xori %27, %31 : vector<8x512xi32>
    %c-1028477387_i32 = arith.constant -1028477387 : i32
    %33 = vector.broadcast %c-1028477387_i32 : i32 to vector<8x512xi32>
    %34 = arith.muli %32, %33 : vector<8x512xi32>
    %c16_i32_7 = arith.constant 16 : i32
    %35 = vector.broadcast %c16_i32_7 : i32 to vector<8x512xi32>
    %36 = arith.shrsi %34, %35 : vector<8x512xi32>
    %c65535_i32_8 = arith.constant 65535 : i32
    %37 = vector.broadcast %c65535_i32_8 : i32 to vector<8x512xi32>
    %38 = arith.andi %36, %37 : vector<8x512xi32>
    %39 = arith.xori %34, %38 : vector<8x512xi32>
    %c2147483647_i32 = arith.constant 2147483647 : i32
    %40 = vector.broadcast %c2147483647_i32 : i32 to vector<8x512xi32>
    %41 = arith.andi %39, %40 : vector<8x512xi32>
    %c858993459_i32 = arith.constant 858993459 : i32
    %42 = vector.broadcast %c858993459_i32 : i32 to vector<8x512xi32>
    %43 = arith.cmpi sge, %41, %42 : vector<8x512xi32>
    %cst_9 = arith.constant 0.000000e+00 : f32
    %44 = vector.broadcast %cst_9 : f32 to vector<8x512xf32>
    %45 = arith.select %43, %9, %44 : vector<8x512xi1>, vector<8x512xf32>
    %46 = arith.truncf %45 : vector<8x512xf32> to vector<8x512xbf16>
    %c0_10 = arith.constant 0 : index
    %c0_11 = arith.constant 0 : index
    %47 = vector.load %arg5[%c0_10, %c0_11] : memref<512x128xbf16, #tpu.memory_space<vmem>>, vector<512x128xbf16>
    %cst_12 = arith.constant dense<0.000000e+00> : vector<8x128xf32>
    %48 = tpu.matmul %46, %47, %cst_12 {dimension_numbers = #tpu.dot_dimension_numbers<[1], [0], [0], [1], [0, 0, 1, 1], [], []>} : vector<8x512xbf16>, vector<512x128xbf16>, vector<8x128xf32> -> vector<8x128xf32>
    %c0_13 = arith.constant 0 : index
    %c0_14 = arith.constant 0 : index
    %49 = vector.load %arg6[%c0_13, %c0_14] : memref<1x128xf32, #tpu.memory_space<vmem>>, vector<1x128xf32>
    %50 = vector.broadcast %49 : vector<1x128xf32> to vector<8x128xf32>
    %51 = arith.addf %48, %50 : vector<8x128xf32>
    %cst_15 = arith.constant 0.000000e+00 : f32
    %52 = vector.broadcast %cst_15 : f32 to vector<8x128xf32>
    %53 = arith.maximumf %51, %52 : vector<8x128xf32>
    %54 = tpu.iota {dimensions = array<i32: 0>} : vector<8x128xi32>
    %55 = vector.broadcast %0 : i32 to vector<8x128xi32>
    %56 = arith.addi %54, %55 : vector<8x128xi32>
    %57 = tpu.iota {dimensions = array<i32: 1>} : vector<8x128xi32>
    %c128_i32 = arith.constant 128 : i32
    %58 = vector.broadcast %c128_i32 : i32 to vector<8x128xi32>
    %59 = arith.muli %56, %58 : vector<8x128xi32>
    %60 = arith.addi %59, %57 : vector<8x128xi32>
    %c1759714724_i32 = arith.constant 1759714724 : i32
    %61 = vector.broadcast %c1759714724_i32 : i32 to vector<8x128xi32>
    %62 = arith.addi %60, %61 : vector<8x128xi32>
    %63 = vector.broadcast %1 : i32 to vector<8x128xi32>
    %64 = arith.xori %62, %63 : vector<8x128xi32>
    %c16_i32_16 = arith.constant 16 : i32
    %65 = vector.broadcast %c16_i32_16 : i32 to vector<8x128xi32>
    %66 = arith.shrsi %64, %65 : vector<8x128xi32>
    %c65535_i32_17 = arith.constant 65535 : i32
    %67 = vector.broadcast %c65535_i32_17 : i32 to vector<8x128xi32>
    %68 = arith.andi %66, %67 : vector<8x128xi32>
    %69 = arith.xori %64, %68 : vector<8x128xi32>
    %c-2048144789_i32_18 = arith.constant -2048144789 : i32
    %70 = vector.broadcast %c-2048144789_i32_18 : i32 to vector<8x128xi32>
    %71 = arith.muli %69, %70 : vector<8x128xi32>
    %c13_i32_19 = arith.constant 13 : i32
    %72 = vector.broadcast %c13_i32_19 : i32 to vector<8x128xi32>
    %73 = arith.shrsi %71, %72 : vector<8x128xi32>
    %c524287_i32_20 = arith.constant 524287 : i32
    %74 = vector.broadcast %c524287_i32_20 : i32 to vector<8x128xi32>
    %75 = arith.andi %73, %74 : vector<8x128xi32>
    %76 = arith.xori %71, %75 : vector<8x128xi32>
    %c-1028477387_i32_21 = arith.constant -1028477387 : i32
    %77 = vector.broadcast %c-1028477387_i32_21 : i32 to vector<8x128xi32>
    %78 = arith.muli %76, %77 : vector<8x128xi32>
    %c16_i32_22 = arith.constant 16 : i32
    %79 = vector.broadcast %c16_i32_22 : i32 to vector<8x128xi32>
    %80 = arith.shrsi %78, %79 : vector<8x128xi32>
    %c65535_i32_23 = arith.constant 65535 : i32
    %81 = vector.broadcast %c65535_i32_23 : i32 to vector<8x128xi32>
    %82 = arith.andi %80, %81 : vector<8x128xi32>
    %83 = arith.xori %78, %82 : vector<8x128xi32>
    %c2147483647_i32_24 = arith.constant 2147483647 : i32
    %84 = vector.broadcast %c2147483647_i32_24 : i32 to vector<8x128xi32>
    %85 = arith.andi %83, %84 : vector<8x128xi32>
    %c858993459_i32_25 = arith.constant 858993459 : i32
    %86 = vector.broadcast %c858993459_i32_25 : i32 to vector<8x128xi32>
    %87 = arith.cmpi sge, %85, %86 : vector<8x128xi32>
    %cst_26 = arith.constant 0.000000e+00 : f32
    %88 = vector.broadcast %cst_26 : f32 to vector<8x128xf32>
    %89 = arith.select %87, %53, %88 : vector<8x128xi1>, vector<8x128xf32>
    %c0_27 = arith.constant 0 : index
    %c0_28 = arith.constant 0 : index
    %90 = vector.load %arg7[%c0_27, %c0_28] : memref<1x128xf32, #tpu.memory_space<vmem>>, vector<1x128xf32>
    %91 = vector.broadcast %90 : vector<1x128xf32> to vector<8x128xf32>
    %92 = arith.mulf %89, %91 : vector<8x128xf32>
    %cst_29 = arith.constant dense<0.000000e+00> : vector<8xf32>
    %93 = vector.multi_reduction <add>, %92, %cst_29 [1] : vector<8x128xf32> to vector<8xf32>
    %94 = vector.shape_cast %93 : vector<8xf32> to vector<8x1xf32>
    %c0_30 = arith.constant 0 : index
    %c0_31 = arith.constant 0 : index
    %95 = vector.load %arg8[%c0_30, %c0_31] : memref<1x1xf32, #tpu.memory_space<vmem>>, vector<1x1xf32>
    %96 = vector.broadcast %95 : vector<1x1xf32> to vector<8x1xf32>
    %97 = arith.addf %94, %96 : vector<8x1xf32>
    %98 = arith.negf %97 : vector<8x1xf32>
    %99 = math.exp %98 : vector<8x1xf32>
    %cst_32 = arith.constant 1.000000e+00 : f32
    %100 = vector.broadcast %cst_32 : f32 to vector<8x1xf32>
    %101 = arith.addf %100, %99 : vector<8x1xf32>
    %102 = arith.divf %100, %101 : vector<8x1xf32>
    %c0_33 = arith.constant 0 : index
    %c0_34 = arith.constant 0 : index
    %103 = vector.load %arg9[%c0_33, %c0_34] : memref<8x1xf32, #tpu.memory_space<vmem>>, vector<8x1xf32>
    tpu.vector_store %arg9[%c0_33, %c0_34], %102 {strides = array<i32>} : memref<8x1xf32, #tpu.memory_space<vmem>>, vector<8x1xf32>,
    return
  }
  func.func @transform_0(%arg0: i32, %arg1: memref<1xi32, #tpu.memory_space<smem>>) -> (i32, i32) {
    %c0_i32 = arith.constant 0 : i32
    %c0_i32_0 = arith.constant 0 : i32
    return %arg0, %c0_i32 : i32, i32
  }
  func.func @transform_1(%arg0: i32, %arg1: memref<1xi32, #tpu.memory_space<smem>>) -> (i32, i32) {
    %c0_i32 = arith.constant 0 : i32
    %c0_i32_0 = arith.constant 0 : i32
    %c0_i32_1 = arith.constant 0 : i32
    return %c0_i32, %c0_i32_0 : i32, i32
  }
  func.func @transform_2(%arg0: i32, %arg1: memref<1xi32, #tpu.memory_space<smem>>) -> (i32, i32) {
    %c0_i32 = arith.constant 0 : i32
    %c0_i32_0 = arith.constant 0 : i32
    %c0_i32_1 = arith.constant 0 : i32
    return %c0_i32, %c0_i32_0 : i32, i32
  }
  func.func @transform_3(%arg0: i32, %arg1: memref<1xi32, #tpu.memory_space<smem>>) -> (i32, i32) {
    %c0_i32 = arith.constant 0 : i32
    %c0_i32_0 = arith.constant 0 : i32
    %c0_i32_1 = arith.constant 0 : i32
    return %c0_i32, %c0_i32_0 : i32, i32
  }
  func.func @transform_4(%arg0: i32, %arg1: memref<1xi32, #tpu.memory_space<smem>>) -> (i32, i32) {
    %c0_i32 = arith.constant 0 : i32
    %c0_i32_0 = arith.constant 0 : i32
    %c0_i32_1 = arith.constant 0 : i32
    return %c0_i32, %c0_i32_0 : i32, i32
  }
  func.func @transform_5(%arg0: i32, %arg1: memref<1xi32, #tpu.memory_space<smem>>) -> (i32, i32) {
    %c0_i32 = arith.constant 0 : i32
    %c0_i32_0 = arith.constant 0 : i32
    %c0_i32_1 = arith.constant 0 : i32
    return %c0_i32, %c0_i32_0 : i32, i32
  }
  func.func @transform_6(%arg0: i32, %arg1: memref<1xi32, #tpu.memory_space<smem>>) -> (i32, i32) {
    %c0_i32 = arith.constant 0 : i32
    %c0_i32_0 = arith.constant 0 : i32
    %c0_i32_1 = arith.constant 0 : i32
    return %c0_i32, %c0_i32_0 : i32, i32
  }
  func.func @transform_7(%arg0: i32, %arg1: memref<1xi32, #tpu.memory_space<smem>>) -> (i32, i32) {
    %c0_i32 = arith.constant 0 : i32
    %c0_i32_0 = arith.constant 0 : i32
    return %arg0, %c0_i32 : i32, i32
  }
}

</mosaic_0001>

<bundles_post_ra>
// kernel: tpu_custom_call.1
= control target key start
LH: loop header
LB: loop body
LE: loop exit
PB: predicated region body
PF: predicated region fallthrough
CT: control target
= control target key end

     0   :  { %s3517_s0 = inlined_call_operand.<no memory space> [shape: s32[1], index: 0, kind: input, shape index: {}]   ;;  %s3518_s1 = inlined_call_operand.hbm [shape: bf16[8,1024], index: 1, kind: input, shape index: {}]   ;;  %s3519_s2 = inlined_call_operand.hbm [shape: bf16[1024,512], index: 2, kind: input, shape index: {}]   ;;  %s3520_s3 = inlined_call_operand.vmem [shape: f32[1,512], index: 3, kind: input, shape index: {}]   ;;  %s3521_s4 = inlined_call_operand.hbm [shape: bf16[512,128], index: 4, kind: input, shape index: {}]   ;;  %s3522_s5 = inlined_call_operand.vmem [shape: f32[1,128], index: 5, kind: input, shape index: {}]   ;;  %s3523_s6 = inlined_call_operand.vmem [shape: f32[1,128], index: 6, kind: input, shape index: {}]   ;;  %s3524_s7 = inlined_call_operand.<no memory space> [shape: f32[1,1], index: 7, kind: input, shape index: {}]   ;;  %s3525_s8 = inlined_call_operand.vmem [shape: f32[8,1], index: 8, kind: output, shape index: {}]  }
   0x1   :  { %v14_v0 = vstv %s3524_s7 }
   0x2   :  { %15 = vst [vmem:[#allocation4] sm:$0x1] %v14_v0 }
   0x3   :  { %16 = vsyncpa [#allocation6], 0 }
   0x4   :  { %17 = vsyncpa [#allocation8], 0  ;;  %s3341_s29 = smov [#allocation7]  }
   0x5   :  { %s33_s30 = sshll.u32 %s3341_s29, 4  ;;  %s34_s30 = int_to_ptr.vmem [resolvable:$true] %s33_s30 }
   0x6   :  { %s3285_s9 = scalar_lea.vmem %s34_s30, 32768  ;;  %p3290_p1 = scmp.lt.s32.totalorder %s34_s30, %s34_s30 }
   0x7   :  { %p3286_p0 = scmp.ne.s32.totalorder %s34_s30, %s3285_s9  ;;  %p3291_p2 = scmp.lt.s32.totalorder %s3285_s9, %s3285_s9 }
   0x9   :  { %p3292_p3 = por %p3291_p2, %p3290_p1 }
   0xb   :  { %p3293_p4 = pnand %p3292_p3, %p3286_p0 }
   0xd   :  { %3296 = shalt.err (!%p3293_p4)
}
   0xe   :  { %s3342_s10 = smov 256   ;;  %s3343_s11 = smov 16  }
   0xf   :  { %39 = dma.hbm_to_vmem [thread:$0]  %s3519_s2, 32768, %s34_s30, [#allocation8], %s3342_s10, %s3342_s10, %s3343_s11  }
  0x10   :  { %s3344_s7 = smov [#allocation5]   ;;  %s3345_s15 = smov [#allocation9]  }
  0x11   :  { %s24_s14 = sshll.u32 %s3344_s7, 4  ;;  %s47_s16 = sshll.u32 %s3345_s15, 4  ;;  %s25_s14 = int_to_ptr.vmem [resolvable:$true] %s24_s14  ;;  %s48_s16 = int_to_ptr.vmem [resolvable:$true] %s47_s16 }
  0x12   :  { %s3305_s17 = scalar_lea.vmem %s25_s14, 512  ;;  %p3310_p6 = scmp.lt.s32.totalorder %s25_s14, %s25_s14 }
  0x13   :  { %p3306_p5 = scmp.ne.s32.totalorder %s25_s14, %s3305_s17  ;;  %p3311_p7 = scmp.lt.s32.totalorder %s3305_s17, %s3305_s17 }
  0x15   :  { %p3312_p8 = por %p3311_p7, %p3310_p6 }
  0x17   :  { %p3313_p9 = pnand %p3312_p8, %p3306_p5 }
  0x19   :  { %3316 = shalt.err (!%p3313_p9)
}
  0x1a   :  { %27 = dma.hbm_to_vmem [thread:$0]  %s3518_s1, 512, %s25_s14, [#allocation6]  }
  0x1b   :  { %s3325_s20 = scalar_lea.vmem %s48_s16, 4096  ;;  %p3330_p11 = scmp.lt.s32.totalorder %s48_s16, %s48_s16 }
  0x1c   :  { %p3326_p10 = scmp.ne.s32.totalorder %s48_s16, %s3325_s20  ;;  %p3331_p12 = scmp.lt.s32.totalorder %s3325_s20, %s3325_s20 }
  0x1e   :  { %p3332_p13 = por %p3331_p12, %p3330_p11 }
  0x20   :  { %p3333_p0 = pnand %p3332_p13, %p3326_p10 }
  0x22   :  { %3336 = shalt.err (!%p3333_p0)
}
  0x23   :  { %s3346_s2 = smov 64   ;;  %s3347_s21 = smov 4  }
  0x24   :  { %53 = dma.hbm_to_vmem [thread:$0]  %s3521_s4, 4096, %s48_s16, [#allocation8], %s3346_s2, %s3346_s2, %s3347_s21  }
  0x25   :  { %3337 = dma.done.wait [#allocation6], 512  }
  0x26   :  { %3338 = vsyncadd [#allocation6], 4294966784 }
  0x27   :  { %3339 = dma.done.wait [#allocation8], 36864  }
  0x28   :  { %3340 = vsyncadd [#allocation8], 4294930432  ;;  %v2849_v1 = vld [vmem:[#allocation7 + $0xe4] ss:$16 sps:$4 sm:$0xff]   ;;  %v2853_v3 = vld [vmem:[#allocation7 + $0xe0] ss:$16 sps:$4 sm:$0xff]  }
  0x29   :  { %v2851_v2 = vld [vmem:[#allocation7 + $0x2e4] ss:$16 sps:$4 sm:$0xff]   ;;  %1662 = vmatprep.subr.bf16.mxu0 %v2849_v1  ;;  %v2854_v4 = vld [vmem:[#allocation7 + $0x2e0] ss:$16 sps:$4 sm:$0xff]   ;;  %v73_v49 = vld [vmem:[#allocation5 + $0x8] sm:$0xff]  ;;  %vm2463_vm9 = vcmask 7168  }
  0x2a   :  { %1703 = vmatprep.subr.bf16.mxu1 %v2851_v2  ;;  %v2855_v5 = vld [vmem:[#allocation7 + $0xc4] ss:$16 sps:$4 sm:$0xff]   ;;  %1663 = vmatpush1.bf16.msra.mxu0 %v2853_v3  ;;  %v2859_v7 = vld [vmem:[#allocation7 + $0xc0] ss:$16 sps:$4 sm:$0xff]   ;;  %v3407_v52 = vcombine.high %v73_v49, %v73_v49 }
  0x2b   :  { %1704 = vmatpush1.bf16.msra.mxu1 %v2854_v4  ;;  %v2857_v6 = vld [vmem:[#allocation7 + $0x2c4] ss:$16 sps:$4 sm:$0xff]   ;;  %1664 = vmatprep.subr.bf16.mxu0 %v2855_v5  ;;  %v2860_v8 = vld [vmem:[#allocation7 + $0x2c0] ss:$16 sps:$4 sm:$0xff]  }
  0x2c   :  { %1705 = vmatprep.subr.bf16.mxu1 %v2857_v6  ;;  %v2861_v9 = vld [vmem:[#allocation7 + $0xa4] ss:$16 sps:$4 sm:$0xff]   ;;  %v2865_v11 = vld [vmem:[#allocation7 + $0xa0] ss:$16 sps:$4 sm:$0xff]   ;;  %1735 = vmatprep.mubr.bf16.mxu1 %v3407_v52 }
  0x2d   :  { %v2863_v10 = vld [vmem:[#allocation7 + $0x2a4] ss:$16 sps:$4 sm:$0xff]   ;;  %v2866_v12 = vld [vmem:[#allocation7 + $0x2a0] ss:$16 sps:$4 sm:$0xff]  }
  0x2e   :  { %1665 = vmatpush1.bf16.msra.mxu0 %v2859_v7  ;;  %v2867_v13 = vld [vmem:[#allocation7 + $0x84] ss:$16 sps:$4 sm:$0xff]   ;;  %v2871_v15 = vld [vmem:[#allocation7 + $0x80] ss:$16 sps:$4 sm:$0xff]  }
  0x2f   :  { %1706 = vmatpush1.bf16.msra.mxu1 %v2860_v8  ;;  %1666 = vmatprep.subr.bf16.mxu0 %v2861_v9  ;;  %v2869_v14 = vld [vmem:[#allocation7 + $0x284] ss:$16 sps:$4 sm:$0xff]   ;;  %v2872_v16 = vld [vmem:[#allocation7 + $0x280] ss:$16 sps:$4 sm:$0xff]   ;;  %v3413_v8 = vcombine.low %v73_v49, %v73_v49 }
  0x30   :  { %1707 = vmatprep.subr.bf16.mxu1 %v2863_v10  ;;  %v2873_v17 = vld [vmem:[#allocation7 + $0x64] ss:$16 sps:$4 sm:$0xff]   ;;  %v2877_v19 = vld [vmem:[#allocation7 + $0x60] ss:$16 sps:$4 sm:$0xff]  }
  0x31   :  { %v2875_v18 = vld [vmem:[#allocation7 + $0x264] ss:$16 sps:$4 sm:$0xff]   ;;  %v2878_v20 = vld [vmem:[#allocation7 + $0x260] ss:$16 sps:$4 sm:$0xff]  }
  0x32   :  { %1667 = vmatpush1.bf16.msra.mxu0 %v2865_v11  ;;  %v2879_v21 = vld [vmem:[#allocation7 + $0x44] ss:$16 sps:$4 sm:$0xff]   ;;  %v2883_v23 = vld [vmem:[#allocation7 + $0x40] ss:$16 sps:$4 sm:$0xff]  }
  0x33   :  { %1708 = vmatpush1.bf16.msra.mxu1 %v2866_v12  ;;  %1668 = vmatprep.subr.bf16.mxu0 %v2867_v13  ;;  %v2881_v22 = vld [vmem:[#allocation7 + $0x244] ss:$16 sps:$4 sm:$0xff]   ;;  %v2884_v24 = vld [vmem:[#allocation7 + $0x240] ss:$16 sps:$4 sm:$0xff]  }
  0x34   :  { %1709 = vmatprep.subr.bf16.mxu1 %v2869_v14  ;;  %v2885_v25 = vld [vmem:[#allocation7 + $0x24] ss:$16 sps:$4 sm:$0xff]   ;;  %v2889_v27 = vld [vmem:[#allocation7 + $0x20] ss:$16 sps:$4 sm:$0xff]  }
  0x35   :  { %v2887_v26 = vld [vmem:[#allocation7 + $0x224] ss:$16 sps:$4 sm:$0xff]   ;;  %v2890_v28 = vld [vmem:[#allocation7 + $0x220] ss:$16 sps:$4 sm:$0xff]  }
  0x36   :  { %1669 = vmatpush1.bf16.msra.mxu0 %v2871_v15  ;;  %v2891_v29 = vld [vmem:[#allocation7 + $0x4] ss:$16 sps:$4 sm:$0xff]   ;;  %v2895_v31 = vld [vmem:[#allocation7] ss:$16 sps:$4 sm:$0xff]  }
  0x37   :  { %1710 = vmatpush1.bf16.msra.mxu1 %v2872_v16  ;;  %1670 = vmatprep.subr.bf16.mxu0 %v2873_v17  ;;  %v2893_v30 = vld [vmem:[#allocation7 + $0x204] ss:$16 sps:$4 sm:$0xff]   ;;  %v2896_v32 = vld [vmem:[#allocation7 + $0x200] ss:$16 sps:$4 sm:$0xff]  }
  0x38   :  { %1711 = vmatprep.subr.bf16.mxu1 %v2875_v18  ;;  %v2897_v33 = vld [vmem:[#allocation7 + $0x1e4] ss:$16 sps:$4 sm:$0xff]   ;;  %v2901_v35 = vld [vmem:[#allocation7 + $0x1e0] ss:$16 sps:$4 sm:$0xff]  }
  0x39   :  { %v2899_v34 = vld [vmem:[#allocation7 + $0x3e4] ss:$16 sps:$4 sm:$0xff]   ;;  %v2902_v36 = vld [vmem:[#allocation7 + $0x3e0] ss:$16 sps:$4 sm:$0xff]  }
  0x3a   :  { %1671 = vmatpush1.bf16.msra.mxu0 %v2877_v19  ;;  %v2903_v37 = vld [vmem:[#allocation7 + $0x1c4] ss:$16 sps:$4 sm:$0xff]   ;;  %v2907_v39 = vld [vmem:[#allocation7 + $0x1c0] ss:$16 sps:$4 sm:$0xff]  }
  0x3b   :  { %1712 = vmatpush1.bf16.msra.mxu1 %v2878_v20  ;;  %1672 = vmatprep.subr.bf16.mxu0 %v2879_v21  ;;  %v2905_v38 = vld [vmem:[#allocation7 + $0x3c4] ss:$16 sps:$4 sm:$0xff]   ;;  %v2908_v40 = vld [vmem:[#allocation7 + $0x3c0] ss:$16 sps:$4 sm:$0xff]  }
  0x3c   :  { %1713 = vmatprep.subr.bf16.mxu1 %v2881_v22  ;;  %v2909_v41 = vld [vmem:[#allocation7 + $0x1a4] ss:$16 sps:$4 sm:$0xff]   ;;  %v2913_v43 = vld [vmem:[#allocation7 + $0x1a0] ss:$16 sps:$4 sm:$0xff]  }
  0x3d   :  { %v2911_v42 = vld [vmem:[#allocation7 + $0x3a4] ss:$16 sps:$4 sm:$0xff]   ;;  %v2914_v44 = vld [vmem:[#allocation7 + $0x3a0] ss:$16 sps:$4 sm:$0xff]  }
  0x3e   :  { %1673 = vmatpush1.bf16.msra.mxu0 %v2883_v23  ;;  %v2915_v45 = vld [vmem:[#allocation7 + $0x184] ss:$16 sps:$4 sm:$0xff]   ;;  %v2919_v50 = vld [vmem:[#allocation7 + $0x180] ss:$16 sps:$4 sm:$0xff]  }
  0x3f   :  { %1714 = vmatpush1.bf16.msra.mxu1 %v2884_v24  ;;  %1674 = vmatprep.subr.bf16.mxu0 %v2885_v25  ;;  %v2917_v46 = vld [vmem:[#allocation7 + $0x384] ss:$16 sps:$4 sm:$0xff]   ;;  %v2920_v51 = vld [vmem:[#allocation7 + $0x380] ss:$16 sps:$4 sm:$0xff]  }
  0x40   :  { %1715 = vmatprep.subr.bf16.mxu1 %v2887_v26  ;;  %v72_v47 = vld [vmem:[#allocation5] sm:$0xff] }
  0x41   :  { %v3405_v48 = vcombine.high %v72_v47, %v72_v47  ;;  %v2921_v53 = vld [vmem:[#allocation7 + $0x164] ss:$16 sps:$4 sm:$0xff]   ;;  %v2925_v55 = vld [vmem:[#allocation7 + $0x160] ss:$16 sps:$4 sm:$0xff]   ;;  %v3411_v7 = vcombine.low %v72_v47, %v72_v47 }
  0x42   :  { %1675 = vmatpush1.bf16.msra.mxu0 %v2889_v27  ;;  %v2923_v54 = vld [vmem:[#allocation7 + $0x364] ss:$16 sps:$4 sm:$0xff]   ;;  %v2926_v56 = vld [vmem:[#allocation7 + $0x360] ss:$16 sps:$4 sm:$0xff]  }
  0x43   :  { %1716 = vmatpush1.bf16.msra.mxu1 %v2890_v28  ;;  %1676 = vmatprep.subr.bf16.mxu0 %v2891_v29  ;;  %v2927_v57 = vld [vmem:[#allocation7 + $0x144] ss:$16 sps:$4 sm:$0xff]   ;;  %v2931_v59 = vld [vmem:[#allocation7 + $0x140] ss:$16 sps:$4 sm:$0xff]  }
  0x44   :  { %1717 = vmatprep.subr.bf16.mxu1 %v2893_v30  ;;  %1694 = vmatprep.mubr.bf16.mxu0 %v3405_v48  ;;  %v2929_v58 = vld [vmem:[#allocation7 + $0x344] ss:$16 sps:$4 sm:$0xff]   ;;  %v2932_v60 = vld [vmem:[#allocation7 + $0x340] ss:$16 sps:$4 sm:$0xff]  }
  0x45   :  { %v2933_v61 = vld [vmem:[#allocation7 + $0x124] ss:$16 sps:$4 sm:$0xff]   ;;  %v2937_v63 = vld [vmem:[#allocation7 + $0x120] ss:$16 sps:$4 sm:$0xff]  }
  0x46   :  { %1677 = vmatpush1.bf16.msra.mxu0 %v2895_v31  ;;  %v2935_v62 = vld [vmem:[#allocation7 + $0x324] ss:$16 sps:$4 sm:$0xff]   ;;  %v2938_v0 = vld [vmem:[#allocation7 + $0x320] ss:$16 sps:$4 sm:$0xff]  }
  0x47   :  { %1718 = vmatpush1.bf16.msra.mxu1 %v2896_v32  ;;  %1678 = vmatprep.subr.bf16.mxu0 %v2897_v33  ;;  %v2939_v1 = vld [vmem:[#allocation7 + $0x104] ss:$16 sps:$4 sm:$0xff]   ;;  %v2943_v3 = vld [vmem:[#allocation7 + $0x100] ss:$16 sps:$4 sm:$0xff]  }
  0x48   :  { %1719 = vmatprep.subr.bf16.mxu1 %v2899_v34  ;;  %v2941_v2 = vld [vmem:[#allocation7 + $0x304] ss:$16 sps:$4 sm:$0xff]   ;;  %v2944_v4 = vld [vmem:[#allocation7 + $0x300] ss:$16 sps:$4 sm:$0xff]   ;;  %v3419_v34 = vld [vmem:[#allocation5 + $0x18] sm:$0xff] }
  0x49   :  { %v2951_v5 = vld [vmem:[#allocation7 + $0x4e4] ss:$16 sps:$4 sm:$0xff]   ;;  %v2949_v9 = vld [vmem:[#allocation7 + $0x4e0] ss:$16 sps:$4 sm:$0xff]  }
  0x4a   :  { %1679 = vmatpush2.bf16.msra.mxu0 %v2901_v35  ;;  %v2954_v6 = vld [vmem:[#allocation7 + $0x6e4] ss:$16 sps:$4 sm:$0xff]   ;;  %v2952_v10 = vld [vmem:[#allocation7 + $0x6e0] ss:$16 sps:$4 sm:$0xff]  }
  0x4b   :  { %1720 = vmatpush2.bf16.msra.mxu1 %v2902_v36  ;;  %1680 = vmatprep.subr.bf16.mxu0 %v2903_v37  ;;  %v2957_v11 = vld [vmem:[#allocation7 + $0x4c4] ss:$16 sps:$4 sm:$0xff]   ;;  %v2955_v13 = vld [vmem:[#allocation7 + $0x4c0] ss:$16 sps:$4 sm:$0xff]  }
  0x4c   :  { %1721 = vmatprep.subr.bf16.mxu1 %v2905_v38  ;;  %v2960_v12 = vld [vmem:[#allocation7 + $0x6c4] ss:$16 sps:$4 sm:$0xff]   ;;  %v2958_v14 = vld [vmem:[#allocation7 + $0x6c0] ss:$16 sps:$4 sm:$0xff]   ;;  %v3427_v38 = vcombine.high %v3419_v34, %v3419_v34 }
  0x4d   :  { %v2963_v15 = vld [vmem:[#allocation7 + $0x4a4] ss:$16 sps:$4 sm:$0xff]   ;;  %v2961_v17 = vld [vmem:[#allocation7 + $0x4a0] ss:$16 sps:$4 sm:$0xff]  }
  0x4e   :  { %1681 = vmatpush2.bf16.msra.mxu0 %v2907_v39  ;;  %v2966_v16 = vld [vmem:[#allocation7 + $0x6a4] ss:$16 sps:$4 sm:$0xff]   ;;  %v2964_v18 = vld [vmem:[#allocation7 + $0x6a0] ss:$16 sps:$4 sm:$0xff]  }
  0x4f   :  { %1722 = vmatpush2.bf16.msra.mxu1 %v2908_v40  ;;  %1682 = vmatprep.subr.bf16.mxu0 %v2909_v41  ;;  %v2969_v19 = vld [vmem:[#allocation7 + $0x484] ss:$16 sps:$4 sm:$0xff]   ;;  %v2967_v21 = vld [vmem:[#allocation7 + $0x480] ss:$16 sps:$4 sm:$0xff]  }
  0x50   :  { %1723 = vmatprep.subr.bf16.mxu1 %v2911_v42  ;;  %v2972_v20 = vld [vmem:[#allocation7 + $0x684] ss:$16 sps:$4 sm:$0xff]   ;;  %v2970_v22 = vld [vmem:[#allocation7 + $0x680] ss:$16 sps:$4 sm:$0xff]  }
  0x51   :  { %v2975_v23 = vld [vmem:[#allocation7 + $0x464] ss:$16 sps:$4 sm:$0xff]   ;;  %v2973_v25 = vld [vmem:[#allocation7 + $0x460] ss:$16 sps:$4 sm:$0xff]  }
  0x52   :  { %1683 = vmatpush2.bf16.msra.mxu0 %v2913_v43  ;;  %v2978_v24 = vld [vmem:[#allocation7 + $0x664] ss:$16 sps:$4 sm:$0xff]   ;;  %v2976_v26 = vld [vmem:[#allocation7 + $0x660] ss:$16 sps:$4 sm:$0xff]  }
  0x53   :  { %1724 = vmatpush2.bf16.msra.mxu1 %v2914_v44  ;;  %1684 = vmatprep.subr.bf16.mxu0 %v2915_v45  ;;  %v2981_v27 = vld [vmem:[#allocation7 + $0x444] ss:$16 sps:$4 sm:$0xff]   ;;  %v2979_v29 = vld [vmem:[#allocation7 + $0x440] ss:$16 sps:$4 sm:$0xff]  }
  0x54   :  { %1725 = vmatprep.subr.bf16.mxu1 %v2917_v46  ;;  %v2984_v28 = vld [vmem:[#allocation7 + $0x644] ss:$16 sps:$4 sm:$0xff]   ;;  %v2982_v30 = vld [vmem:[#allocation7 + $0x640] ss:$16 sps:$4 sm:$0xff]  }
  0x55   :  { %v2987_v31 = vld [vmem:[#allocation7 + $0x424] ss:$16 sps:$4 sm:$0xff]   ;;  %v2985_v35 = vld [vmem:[#allocation7 + $0x420] ss:$16 sps:$4 sm:$0xff]  }
  0x56   :  { %1685 = vmatpush2.bf16.msra.mxu0 %v2919_v50  ;;  %v2990_v32 = vld [vmem:[#allocation7 + $0x624] ss:$16 sps:$4 sm:$0xff]   ;;  %v2988_v36 = vld [vmem:[#allocation7 + $0x620] ss:$16 sps:$4 sm:$0xff]  }
  0x57   :  { %1726 = vmatpush2.bf16.msra.mxu1 %v2920_v51  ;;  %1686 = vmatprep.subr.bf16.mxu0 %v2921_v53  ;;  %v3417_v33 = vld [vmem:[#allocation5 + $0x10] sm:$0xff] }
  0x58   :  { %1727 = vmatprep.subr.bf16.mxu1 %v2923_v54  ;;  %v3423_v37 = vcombine.high %v3417_v33, %v3417_v33  ;;  %v2993_v39 = vld [vmem:[#allocation7 + $0x404] ss:$16 sps:$4 sm:$0xff]   ;;  %v2991_v41 = vld [vmem:[#allocation7 + $0x400] ss:$16 sps:$4 sm:$0xff]  }
  0x59   :  { %v2996_v40 = vld [vmem:[#allocation7 + $0x604] ss:$16 sps:$4 sm:$0xff]   ;;  %v2994_v42 = vld [vmem:[#allocation7 + $0x600] ss:$16 sps:$4 sm:$0xff]  }
  0x5a   :  { %1687 = vmatpush2.bf16.msra.mxu0 %v2925_v55  ;;  %v2999_v43 = vld [vmem:[#allocation7 + $0x5e4] ss:$16 sps:$4 sm:$0xff]   ;;  %v2997_v45 = vld [vmem:[#allocation7 + $0x5e0] ss:$16 sps:$4 sm:$0xff]  }
  0x5b   :  { %1728 = vmatpush2.bf16.msra.mxu1 %v2926_v56  ;;  %1688 = vmatprep.subr.bf16.mxu0 %v2927_v57  ;;  %v3002_v44 = vld [vmem:[#allocation7 + $0x7e4] ss:$16 sps:$4 sm:$0xff]   ;;  %v3000_v46 = vld [vmem:[#allocation7 + $0x7e0] ss:$16 sps:$4 sm:$0xff]  }
  0x5c   :  { %1729 = vmatprep.subr.bf16.mxu1 %v2929_v58  ;;  %v3005_v47 = vld [vmem:[#allocation7 + $0x5c4] ss:$16 sps:$4 sm:$0xff]   ;;  %v3003_v50 = vld [vmem:[#allocation7 + $0x5c0] ss:$16 sps:$4 sm:$0xff]  }
  0x5d   :  { %v3008_v49 = vld [vmem:[#allocation7 + $0x7c4] ss:$16 sps:$4 sm:$0xff]   ;;  %v3006_v51 = vld [vmem:[#allocation7 + $0x7c0] ss:$16 sps:$4 sm:$0xff]  }
  0x5e   :  { %1689 = vmatpush2.bf16.msra.mxu0 %v2931_v59  ;;  %v3011_v53 = vld [vmem:[#allocation7 + $0x5a4] ss:$16 sps:$4 sm:$0xff]   ;;  %v3009_v55 = vld [vmem:[#allocation7 + $0x5a0] ss:$16 sps:$4 sm:$0xff]  }
  0x5f   :  { %1730 = vmatpush2.bf16.msra.mxu1 %v2932_v60  ;;  %1690 = vmatprep.subr.bf16.mxu0 %v2933_v61  ;;  %v3014_v54 = vld [vmem:[#allocation7 + $0x7a4] ss:$16 sps:$4 sm:$0xff]   ;;  %v3012_v56 = vld [vmem:[#allocation7 + $0x7a0] ss:$16 sps:$4 sm:$0xff]  }
  0x60   :  { %1731 = vmatprep.subr.bf16.mxu1 %v2935_v62  ;;  %v3017_v57 = vld [vmem:[#allocation7 + $0x584] ss:$16 sps:$4 sm:$0xff]   ;;  %v3015_v59 = vld [vmem:[#allocation7 + $0x580] ss:$16 sps:$4 sm:$0xff]  }
  0x61   :  { %v3020_v58 = vld [vmem:[#allocation7 + $0x784] ss:$16 sps:$4 sm:$0xff]   ;;  %v3018_v60 = vld [vmem:[#allocation7 + $0x780] ss:$16 sps:$4 sm:$0xff]  }
  0x62   :  { %1691 = vmatpush2.bf16.msra.mxu0 %v2937_v63  ;;  %v3023_v61 = vld [vmem:[#allocation7 + $0x564] ss:$16 sps:$4 sm:$0xff]   ;;  %v3021_v63 = vld [vmem:[#allocation7 + $0x560] ss:$16 sps:$4 sm:$0xff]  }
  0x63   :  { %1732 = vmatpush2.bf16.msra.mxu1 %v2938_v0  ;;  %1692 = vmatprep.subr.bf16.mxu0 %v2939_v1  ;;  %v3026_v62 = vld [vmem:[#allocation7 + $0x764] ss:$16 sps:$4 sm:$0xff]   ;;  %v3024_v0 = vld [vmem:[#allocation7 + $0x760] ss:$16 sps:$4 sm:$0xff]  }
  0x64   :  { %1733 = vmatprep.subr.bf16.mxu1 %v2941_v2  ;;  %v3029_v1 = vld [vmem:[#allocation7 + $0x544] ss:$16 sps:$4 sm:$0xff]  }
  0x65   :  { %v3032_v2 = vld [vmem:[#allocation7 + $0x744] ss:$16 sps:$4 sm:$0xff]  }
  0x66   :  { %1693 = vmatpush2.bf16.msra.mxu0 %v2943_v3  ;;  %v3027_v3 = vld [vmem:[#allocation7 + $0x540] ss:$16 sps:$4 sm:$0xff]  }
  0x67   :  { %1734 = vmatpush2.bf16.msra.mxu1 %v2944_v4  ;;  %1744 = vmatprep.subr.bf16.mxu0 %v2951_v5  ;;  %v3030_v4 = vld [vmem:[#allocation7 + $0x740] ss:$16 sps:$4 sm:$0xff]   ;;  %v3035_v5 = vld [vmem:[#allocation7 + $0x524] ss:$16 sps:$4 sm:$0xff]  }
  0x68   :  { %1785 = vmatprep.subr.bf16.mxu1 %v2954_v6  ;;  %v3038_v6 = vld [vmem:[#allocation7 + $0x724] ss:$16 sps:$4 sm:$0xff]  }
  0x69   :  { %1695 = vmatmul.mubr.bf16.vlgmr.msra.gmra.mxu0 %v3411_v7 }
  0x6a   :  { %1736 = vmatmul.mubr.bf16.vlgmr.msra.gmra.mxu1 %v3413_v8  ;;  %1745 = vmatpush1.bf16.msra.mxu0 %v2949_v9  ;;  %v3033_v9 = vld [vmem:[#allocation7 + $0x520] ss:$16 sps:$4 sm:$0xff]  }
  0x6b   :  { %1786 = vmatpush1.bf16.msra.mxu1 %v2952_v10  ;;  %1746 = vmatprep.subr.bf16.mxu0 %v2957_v11  ;;  %v3036_v10 = vld [vmem:[#allocation7 + $0x720] ss:$16 sps:$4 sm:$0xff]   ;;  %v3041_v11 = vld [vmem:[#allocation7 + $0x504] ss:$16 sps:$4 sm:$0xff]  }
  0x6c   :  { %1787 = vmatprep.subr.bf16.mxu1 %v2960_v12  ;;  %1776 = vmatprep.mubr.bf16.mxu0 %v3423_v37  ;;  %v3044_v12 = vld [vmem:[#allocation7 + $0x704] ss:$16 sps:$4 sm:$0xff]  }
  0x6d   :  { %1817 = vmatprep.mubr.bf16.mxu1 %v3427_v38 }
  0x6e   :  { %1747 = vmatpush1.bf16.msra.mxu0 %v2955_v13  ;;  %v3039_v13 = vld [vmem:[#allocation7 + $0x500] ss:$16 sps:$4 sm:$0xff]  }
  0x6f   :  { %1788 = vmatpush1.bf16.msra.mxu1 %v2958_v14  ;;  %1748 = vmatprep.subr.bf16.mxu0 %v2963_v15  ;;  %v3042_v14 = vld [vmem:[#allocation7 + $0x700] ss:$16 sps:$4 sm:$0xff]   ;;  %v3051_v15 = vld [vmem:[#allocation7 + $0xec] ss:$16 sps:$4 sm:$0xff]  }
  0x70   :  { %1789 = vmatprep.subr.bf16.mxu1 %v2966_v16  ;;  %v3054_v16 = vld [vmem:[#allocation7 + $0x2ec] ss:$16 sps:$4 sm:$0xff]  }
  0x72   :  { %1749 = vmatpush1.bf16.msra.mxu0 %v2961_v17  ;;  %v3433_v17 = vcombine.low %v3417_v33, %v3417_v33  ;;  %v3075_v33 = vld [vmem:[#allocation7 + $0x6c] ss:$16 sps:$4 sm:$0xff]  }
  0x73   :  { %1790 = vmatpush1.bf16.msra.mxu1 %v2964_v18  ;;  %1750 = vmatprep.subr.bf16.mxu0 %v2969_v19  ;;  %v3437_v18 = vcombine.low %v3419_v34, %v3419_v34  ;;  %v3049_v19 = vld [vmem:[#allocation7 + $0xe8] ss:$16 sps:$4 sm:$0xff]   ;;  %v3078_v34 = vld [vmem:[#allocation7 + $0x26c] ss:$16 sps:$4 sm:$0xff]  }
  0x74   :  { %1791 = vmatprep.subr.bf16.mxu1 %v2972_v20  ;;  %v3052_v20 = vld [vmem:[#allocation7 + $0x2e8] ss:$16 sps:$4 sm:$0xff]  }
  0x76   :  { %1751 = vmatpush1.bf16.msra.mxu0 %v2967_v21  ;;  %v3057_v21 = vld [vmem:[#allocation7 + $0xcc] ss:$16 sps:$4 sm:$0xff]  }
  0x77   :  { %1792 = vmatpush1.bf16.msra.mxu1 %v2970_v22  ;;  %1752 = vmatprep.subr.bf16.mxu0 %v2975_v23  ;;  %v3060_v22 = vld [vmem:[#allocation7 + $0x2cc] ss:$16 sps:$4 sm:$0xff]   ;;  %v3055_v23 = vld [vmem:[#allocation7 + $0xc8] ss:$16 sps:$4 sm:$0xff]  }
  0x78   :  { %1793 = vmatprep.subr.bf16.mxu1 %v2978_v24  ;;  %v3058_v24 = vld [vmem:[#allocation7 + $0x2c8] ss:$16 sps:$4 sm:$0xff]  }
  0x7a   :  { %1753 = vmatpush1.bf16.msra.mxu0 %v2973_v25  ;;  %v3063_v25 = vld [vmem:[#allocation7 + $0xac] ss:$16 sps:$4 sm:$0xff]  }
  0x7b   :  { %1794 = vmatpush1.bf16.msra.mxu1 %v2976_v26  ;;  %1754 = vmatprep.subr.bf16.mxu0 %v2981_v27  ;;  %v3066_v26 = vld [vmem:[#allocation7 + $0x2ac] ss:$16 sps:$4 sm:$0xff]   ;;  %v3061_v27 = vld [vmem:[#allocation7 + $0xa8] ss:$16 sps:$4 sm:$0xff]  }
  0x7c   :  { %1795 = vmatprep.subr.bf16.mxu1 %v2984_v28  ;;  %v3064_v28 = vld [vmem:[#allocation7 + $0x2a8] ss:$16 sps:$4 sm:$0xff]  }
  0x7e   :  { %1755 = vmatpush1.bf16.msra.mxu0 %v2979_v29  ;;  %v3069_v29 = vld [vmem:[#allocation7 + $0x8c] ss:$16 sps:$4 sm:$0xff]  }
  0x7f   :  { %1796 = vmatpush1.bf16.msra.mxu1 %v2982_v30  ;;  %1756 = vmatprep.subr.bf16.mxu0 %v2987_v31  ;;  %v3072_v30 = vld [vmem:[#allocation7 + $0x28c] ss:$16 sps:$4 sm:$0xff]   ;;  %v3067_v31 = vld [vmem:[#allocation7 + $0x88] ss:$16 sps:$4 sm:$0xff]  }
  0x80   :  { %1797 = vmatprep.subr.bf16.mxu1 %v2990_v32  ;;  %v3070_v32 = vld [vmem:[#allocation7 + $0x288] ss:$16 sps:$4 sm:$0xff]  }
  0x82   :  { %1757 = vmatpush1.bf16.msra.mxu0 %v2985_v35  ;;  %v3073_v35 = vld [vmem:[#allocation7 + $0x68] ss:$16 sps:$4 sm:$0xff]  }
  0x83   :  { %1798 = vmatpush1.bf16.msra.mxu1 %v2988_v36  ;;  %1758 = vmatprep.subr.bf16.mxu0 %v2993_v39  ;;  %v3084_v36 = vld [vmem:[#allocation7 + $0x24c] ss:$16 sps:$4 sm:$0xff]   ;;  %v3079_v39 = vld [vmem:[#allocation7 + $0x48] ss:$16 sps:$4 sm:$0xff]  }
  0x84   :  { %1799 = vmatprep.subr.bf16.mxu1 %v2996_v40  ;;  %v3082_v40 = vld [vmem:[#allocation7 + $0x248] ss:$16 sps:$4 sm:$0xff]  }
  0x86   :  { %1759 = vmatpush1.bf16.msra.mxu0 %v2991_v41  ;;  %v3087_v41 = vld [vmem:[#allocation7 + $0x2c] ss:$16 sps:$4 sm:$0xff]  }
  0x87   :  { %1800 = vmatpush1.bf16.msra.mxu1 %v2994_v42  ;;  %1760 = vmatprep.subr.bf16.mxu0 %v2999_v43  ;;  %v3090_v42 = vld [vmem:[#allocation7 + $0x22c] ss:$16 sps:$4 sm:$0xff]   ;;  %v3085_v43 = vld [vmem:[#allocation7 + $0x28] ss:$16 sps:$4 sm:$0xff]  }
  0x88   :  { %1801 = vmatprep.subr.bf16.mxu1 %v3002_v44  ;;  %v3088_v44 = vld [vmem:[#allocation7 + $0x228] ss:$16 sps:$4 sm:$0xff]  }
  0x8a   :  { %1761 = vmatpush2.bf16.msra.mxu0 %v2997_v45  ;;  %v3093_v45 = vld [vmem:[#allocation7 + $0xc] ss:$16 sps:$4 sm:$0xff]  }
  0x8b   :  { %1802 = vmatpush2.bf16.msra.mxu1 %v3000_v46  ;;  %1762 = vmatprep.subr.bf16.mxu0 %v3005_v47  ;;  %v3096_v46 = vld [vmem:[#allocation7 + $0x20c] ss:$16 sps:$4 sm:$0xff]   ;;  %v3091_v47 = vld [vmem:[#allocation7 + $0x8] ss:$16 sps:$4 sm:$0xff]  }
  0x8c   :  { %1803 = vmatprep.subr.bf16.mxu1 %v3008_v49  ;;  %v3094_v49 = vld [vmem:[#allocation7 + $0x208] ss:$16 sps:$4 sm:$0xff]  }
  0x8e   :  { %1763 = vmatpush2.bf16.msra.mxu0 %v3003_v50  ;;  %v3099_v50 = vld [vmem:[#allocation7 + $0x1ec] ss:$16 sps:$4 sm:$0xff]  }
  0x8f   :  { %1804 = vmatpush2.bf16.msra.mxu1 %v3006_v51  ;;  %1764 = vmatprep.subr.bf16.mxu0 %v3011_v53  ;;  %v3102_v51 = vld [vmem:[#allocation7 + $0x3ec] ss:$16 sps:$4 sm:$0xff]   ;;  %v3097_v53 = vld [vmem:[#allocation7 + $0x1e8] ss:$16 sps:$4 sm:$0xff]  }
  0x90   :  { %1805 = vmatprep.subr.bf16.mxu1 %v3014_v54  ;;  %v3100_v54 = vld [vmem:[#allocation7 + $0x3e8] ss:$16 sps:$4 sm:$0xff]  }
  0x92   :  { %1765 = vmatpush2.bf16.msra.mxu0 %v3009_v55  ;;  %v3105_v55 = vld [vmem:[#allocation7 + $0x1cc] ss:$16 sps:$4 sm:$0xff]  }
  0x93   :  { %1806 = vmatpush2.bf16.msra.mxu1 %v3012_v56  ;;  %1766 = vmatprep.subr.bf16.mxu0 %v3017_v57  ;;  %v3108_v56 = vld [vmem:[#allocation7 + $0x3cc] ss:$16 sps:$4 sm:$0xff]   ;;  %v3103_v57 = vld [vmem:[#allocation7 + $0x1c8] ss:$16 sps:$4 sm:$0xff]  }
  0x94   :  { %1807 = vmatprep.subr.bf16.mxu1 %v3020_v58  ;;  %v3106_v58 = vld [vmem:[#allocation7 + $0x3c8] ss:$16 sps:$4 sm:$0xff]  }
  0x96   :  { %1767 = vmatpush2.bf16.msra.mxu0 %v3015_v59  ;;  %v3111_v59 = vld [vmem:[#allocation7 + $0x1ac] ss:$16 sps:$4 sm:$0xff]  }
  0x97   :  { %1808 = vmatpush2.bf16.msra.mxu1 %v3018_v60  ;;  %1768 = vmatprep.subr.bf16.mxu0 %v3023_v61  ;;  %v3114_v60 = vld [vmem:[#allocation7 + $0x3ac] ss:$16 sps:$4 sm:$0xff]   ;;  %v3109_v61 = vld [vmem:[#allocation7 + $0x1a8] ss:$16 sps:$4 sm:$0xff]  }
  0x98   :  { %1809 = vmatprep.subr.bf16.mxu1 %v3026_v62  ;;  %v3112_v62 = vld [vmem:[#allocation7 + $0x3a8] ss:$16 sps:$4 sm:$0xff]  }
  0x9a   :  { %1769 = vmatpush2.bf16.msra.mxu0 %v3021_v63  ;;  %v3117_v63 = vld [vmem:[#allocation7 + $0x18c] ss:$16 sps:$4 sm:$0xff]  }
  0x9b   :  { %1810 = vmatpush2.bf16.msra.mxu1 %v3024_v0  ;;  %1770 = vmatprep.subr.bf16.mxu0 %v3029_v1  ;;  %v3120_v0 = vld [vmem:[#allocation7 + $0x38c] ss:$16 sps:$4 sm:$0xff]   ;;  %v3115_v1 = vld [vmem:[#allocation7 + $0x188] ss:$16 sps:$4 sm:$0xff]  }
  0x9c   :  { %1811 = vmatprep.subr.bf16.mxu1 %v3032_v2  ;;  %v3118_v2 = vld [vmem:[#allocation7 + $0x388] ss:$16 sps:$4 sm:$0xff]  }
  0x9e   :  { %1771 = vmatpush2.bf16.msra.mxu0 %v3027_v3  ;;  %v3123_v3 = vld [vmem:[#allocation7 + $0x16c] ss:$16 sps:$4 sm:$0xff]  }
  0x9f   :  { %1812 = vmatpush2.bf16.msra.mxu1 %v3030_v4  ;;  %1772 = vmatprep.subr.bf16.mxu0 %v3035_v5  ;;  %v3126_v4 = vld [vmem:[#allocation7 + $0x36c] ss:$16 sps:$4 sm:$0xff]   ;;  %v3121_v5 = vld [vmem:[#allocation7 + $0x168] ss:$16 sps:$4 sm:$0xff]  }
  0xa0   :  { %1813 = vmatprep.subr.bf16.mxu1 %v3038_v6  ;;  %v3124_v6 = vld [vmem:[#allocation7 + $0x368] ss:$16 sps:$4 sm:$0xff]  }
  0xa2   :  { %1773 = vmatpush2.bf16.msra.mxu0 %v3033_v9  ;;  %v3129_v9 = vld [vmem:[#allocation7 + $0x14c] ss:$16 sps:$4 sm:$0xff]  }
  0xa3   :  { %1814 = vmatpush2.bf16.msra.mxu1 %v3036_v10  ;;  %1774 = vmatprep.subr.bf16.mxu0 %v3041_v11  ;;  %v3132_v10 = vld [vmem:[#allocation7 + $0x34c] ss:$16 sps:$4 sm:$0xff]   ;;  %v3127_v11 = vld [vmem:[#allocation7 + $0x148] ss:$16 sps:$4 sm:$0xff]  }
  0xa4   :  { %1815 = vmatprep.subr.bf16.mxu1 %v3044_v12  ;;  %v3130_v12 = vld [vmem:[#allocation7 + $0x348] ss:$16 sps:$4 sm:$0xff]  }
  0xa6   :  { %1775 = vmatpush2.bf16.msra.mxu0 %v3039_v13  ;;  %v3135_v13 = vld [vmem:[#allocation7 + $0x12c] ss:$16 sps:$4 sm:$0xff]  }
  0xa7   :  { %1816 = vmatpush2.bf16.msra.mxu1 %v3042_v14  ;;  %1826 = vmatprep.subr.bf16.mxu0 %v3051_v15  ;;  %v3138_v14 = vld [vmem:[#allocation7 + $0x32c] ss:$16 sps:$4 sm:$0xff]   ;;  %v3133_v15 = vld [vmem:[#allocation7 + $0x128] ss:$16 sps:$4 sm:$0xff]  }
  0xa8   :  { %1867 = vmatprep.subr.bf16.mxu1 %v3054_v16  ;;  %v3136_v16 = vld [vmem:[#allocation7 + $0x328] ss:$16 sps:$4 sm:$0xff]  }
  0xa9   :  { %1777 = vmatmul.mubr.bf16.vlgmr.msra.gmra.mxu0 %v3433_v17 }
  0xaa   :  { %1818 = vmatmul.mubr.bf16.vlgmr.msra.gmra.mxu1 %v3437_v18  ;;  %1827 = vmatpush1.bf16.msra.mxu0 %v3049_v19  ;;  %v3141_v19 = vld [vmem:[#allocation7 + $0x10c] ss:$16 sps:$4 sm:$0xff]  }
  0xab   :  { %1868 = vmatpush1.bf16.msra.mxu1 %v3052_v20  ;;  %1828 = vmatprep.subr.bf16.mxu0 %v3057_v21  ;;  %v3144_v20 = vld [vmem:[#allocation7 + $0x30c] ss:$16 sps:$4 sm:$0xff]   ;;  %v3139_v21 = vld [vmem:[#allocation7 + $0x108] ss:$16 sps:$4 sm:$0xff]  }
  0xac   :  { %1869 = vmatprep.subr.bf16.mxu1 %v3060_v22  ;;  %1858 = vmatprep.mubr.bf16.mxu0 %v3405_v48  ;;  %v3076_v48 = vld [vmem:[#allocation7 + $0x268] ss:$16 sps:$4 sm:$0xff]  }
  0xad   :  { %1899 = vmatprep.mubr.bf16.mxu1 %v3407_v52  ;;  %v3081_v52 = vld [vmem:[#allocation7 + $0x4c] ss:$16 sps:$4 sm:$0xff]   ;;  %v3142_v22 = vld [vmem:[#allocation7 + $0x308] ss:$16 sps:$4 sm:$0xff]  }
  0xae   :  { %1829 = vmatpush1.bf16.msra.mxu0 %v3055_v23  ;;  %v3147_v23 = vld [vmem:[#allocation7 + $0x4ec] ss:$16 sps:$4 sm:$0xff]  }
  0xaf   :  { %1870 = vmatpush1.bf16.msra.mxu1 %v3058_v24  ;;  %1830 = vmatprep.subr.bf16.mxu0 %v3063_v25  ;;  %v3150_v24 = vld [vmem:[#allocation7 + $0x6ec] ss:$16 sps:$4 sm:$0xff]   ;;  %v3145_v25 = vld [vmem:[#allocation7 + $0x4e8] ss:$16 sps:$4 sm:$0xff]  }
  0xb0   :  { %1871 = vmatprep.subr.bf16.mxu1 %v3066_v26  ;;  %v3148_v26 = vld [vmem:[#allocation7 + $0x6e8] ss:$16 sps:$4 sm:$0xff]  }
  0xb2   :  { %1831 = vmatpush1.bf16.msra.mxu0 %v3061_v27  ;;  %v3153_v27 = vld [vmem:[#allocation7 + $0x4cc] ss:$16 sps:$4 sm:$0xff]  }
  0xb3   :  { %1872 = vmatpush1.bf16.msra.mxu1 %v3064_v28  ;;  %1832 = vmatprep.subr.bf16.mxu0 %v3069_v29  ;;  %v3156_v28 = vld [vmem:[#allocation7 + $0x6cc] ss:$16 sps:$4 sm:$0xff]   ;;  %v3151_v29 = vld [vmem:[#allocation7 + $0x4c8] ss:$16 sps:$4 sm:$0xff]  }
  0xb4   :  { %1873 = vmatprep.subr.bf16.mxu1 %v3072_v30  ;;  %v3154_v30 = vld [vmem:[#allocation7 + $0x6c8] ss:$16 sps:$4 sm:$0xff]  }
  0xb6   :  { %1833 = vmatpush1.bf16.msra.mxu0 %v3067_v31  ;;  %v3159_v31 = vld [vmem:[#allocation7 + $0x4ac] ss:$16 sps:$4 sm:$0xff]  }
  0xb7   :  { %1874 = vmatpush1.bf16.msra.mxu1 %v3070_v32  ;;  %1834 = vmatprep.subr.bf16.mxu0 %v3075_v33  ;;  %v3162_v32 = vld [vmem:[#allocation7 + $0x6ac] ss:$16 sps:$4 sm:$0xff]   ;;  %v3157_v33 = vld [vmem:[#allocation7 + $0x4a8] ss:$16 sps:$4 sm:$0xff]  }
  0xb8   :  { %1875 = vmatprep.subr.bf16.mxu1 %v3078_v34  ;;  %v3160_v34 = vld [vmem:[#allocation7 + $0x6a8] ss:$16 sps:$4 sm:$0xff]  }
  0xba   :  { %1835 = vmatpush1.bf16.msra.mxu0 %v3073_v35  ;;  %v3165_v35 = vld [vmem:[#allocation7 + $0x48c] ss:$16 sps:$4 sm:$0xff]  }
  0xbb   :  { %1876 = vmatpush1.bf16.msra.mxu1 %v3076_v48  ;;  %1836 = vmatprep.subr.bf16.mxu0 %v3081_v52  ;;  %v3166_v48 = vld [vmem:[#allocation7 + $0x688] ss:$16 sps:$4 sm:$0xff]   ;;  %v3171_v52 = vld [vmem:[#allocation7 + $0x46c] ss:$16 sps:$4 sm:$0xff]  }
  0xbc   :  { %1877 = vmatprep.subr.bf16.mxu1 %v3084_v36  ;;  %v3174_v36 = vld [vmem:[#allocation7 + $0x66c] ss:$16 sps:$4 sm:$0xff]  }
  0xbe   :  { %1837 = vmatpush1.bf16.msra.mxu0 %v3079_v39  ;;  %v3177_v39 = vld [vmem:[#allocation7 + $0x44c] ss:$16 sps:$4 sm:$0xff]  }
  0xbf   :  { %1878 = vmatpush1.bf16.msra.mxu1 %v3082_v40  ;;  %1838 = vmatprep.subr.bf16.mxu0 %v3087_v41  ;;  %v3180_v40 = vld [vmem:[#allocation7 + $0x64c] ss:$16 sps:$4 sm:$0xff]   ;;  %v3175_v41 = vld [vmem:[#allocation7 + $0x448] ss:$16 sps:$4 sm:$0xff]  }
  0xc0   :  { %1879 = vmatprep.subr.bf16.mxu1 %v3090_v42  ;;  %v3178_v42 = vld [vmem:[#allocation7 + $0x648] ss:$16 sps:$4 sm:$0xff]  }
  0xc2   :  { %1839 = vmatpush1.bf16.msra.mxu0 %v3085_v43  ;;  %v3183_v43 = vld [vmem:[#allocation7 + $0x42c] ss:$16 sps:$4 sm:$0xff]  }
  0xc3   :  { %1880 = vmatpush1.bf16.msra.mxu1 %v3088_v44  ;;  %1840 = vmatprep.subr.bf16.mxu0 %v3093_v45  ;;  %v3186_v44 = vld [vmem:[#allocation7 + $0x62c] ss:$16 sps:$4 sm:$0xff]   ;;  %v3181_v45 = vld [vmem:[#allocation7 + $0x428] ss:$16 sps:$4 sm:$0xff]  }
  0xc4   :  { %1881 = vmatprep.subr.bf16.mxu1 %v3096_v46  ;;  %v3184_v46 = vld [vmem:[#allocation7 + $0x628] ss:$16 sps:$4 sm:$0xff]  }
  0xc6   :  { %1841 = vmatpush1.bf16.msra.mxu0 %v3091_v47  ;;  %v3189_v47 = vld [vmem:[#allocation7 + $0x40c] ss:$16 sps:$4 sm:$0xff]  }
  0xc7   :  { %1882 = vmatpush1.bf16.msra.mxu1 %v3094_v49  ;;  %1842 = vmatprep.subr.bf16.mxu0 %v3099_v50  ;;  %v3192_v49 = vld [vmem:[#allocation7 + $0x60c] ss:$16 sps:$4 sm:$0xff]   ;;  %v3187_v50 = vld [vmem:[#allocation7 + $0x408] ss:$16 sps:$4 sm:$0xff]  }
  0xc8   :  { %1883 = vmatprep.subr.bf16.mxu1 %v3102_v51  ;;  %v3190_v51 = vld [vmem:[#allocation7 + $0x608] ss:$16 sps:$4 sm:$0xff]  }
  0xca   :  { %1843 = vmatpush2.bf16.msra.mxu0 %v3097_v53  ;;  %v3195_v53 = vld [vmem:[#allocation7 + $0x5ec] ss:$16 sps:$4 sm:$0xff]  }
  0xcb   :  { %1884 = vmatpush2.bf16.msra.mxu1 %v3100_v54  ;;  %1844 = vmatprep.subr.bf16.mxu0 %v3105_v55  ;;  %v3198_v54 = vld [vmem:[#allocation7 + $0x7ec] ss:$16 sps:$4 sm:$0xff]   ;;  %v3193_v55 = vld [vmem:[#allocation7 + $0x5e8] ss:$16 sps:$4 sm:$0xff]  }
  0xcc   :  { %1885 = vmatprep.subr.bf16.mxu1 %v3108_v56  ;;  %v3196_v56 = vld [vmem:[#allocation7 + $0x7e8] ss:$16 sps:$4 sm:$0xff]  }
  0xce   :  { %1845 = vmatpush2.bf16.msra.mxu0 %v3103_v57  ;;  %v3201_v57 = vld [vmem:[#allocation7 + $0x5cc] ss:$16 sps:$4 sm:$0xff]  }
  0xcf   :  { %1886 = vmatpush2.bf16.msra.mxu1 %v3106_v58  ;;  %1846 = vmatprep.subr.bf16.mxu0 %v3111_v59  ;;  %v3204_v58 = vld [vmem:[#allocation7 + $0x7cc] ss:$16 sps:$4 sm:$0xff]   ;;  %v3199_v59 = vld [vmem:[#allocation7 + $0x5c8] ss:$16 sps:$4 sm:$0xff]  }
  0xd0   :  { %1887 = vmatprep.subr.bf16.mxu1 %v3114_v60  ;;  %v3202_v60 = vld [vmem:[#allocation7 + $0x7c8] ss:$16 sps:$4 sm:$0xff]  }
  0xd2   :  { %1847 = vmatpush2.bf16.msra.mxu0 %v3109_v61  ;;  %v3207_v61 = vld [vmem:[#allocation7 + $0x5ac] ss:$16 sps:$4 sm:$0xff]  }
  0xd3   :  { %1888 = vmatpush2.bf16.msra.mxu1 %v3112_v62  ;;  %1848 = vmatprep.subr.bf16.mxu0 %v3117_v63  ;;  %v3210_v62 = vld [vmem:[#allocation7 + $0x7ac] ss:$16 sps:$4 sm:$0xff]   ;;  %v3205_v63 = vld [vmem:[#allocation7 + $0x5a8] ss:$16 sps:$4 sm:$0xff]  }
  0xd4   :  { %1889 = vmatprep.subr.bf16.mxu1 %v3120_v0  ;;  %v3208_v0 = vld [vmem:[#allocation7 + $0x7a8] ss:$16 sps:$4 sm:$0xff]  }
  0xd6   :  { %1849 = vmatpush2.bf16.msra.mxu0 %v3115_v1  ;;  %v3213_v1 = vld [vmem:[#allocation7 + $0x58c] ss:$16 sps:$4 sm:$0xff]  }
  0xd7   :  { %1890 = vmatpush2.bf16.msra.mxu1 %v3118_v2  ;;  %1850 = vmatprep.subr.bf16.mxu0 %v3123_v3  ;;  %v3216_v2 = vld [vmem:[#allocation7 + $0x78c] ss:$16 sps:$4 sm:$0xff]   ;;  %v3211_v3 = vld [vmem:[#allocation7 + $0x588] ss:$16 sps:$4 sm:$0xff]  }
  0xd8   :  { %1891 = vmatprep.subr.bf16.mxu1 %v3126_v4  ;;  %v3214_v4 = vld [vmem:[#allocation7 + $0x788] ss:$16 sps:$4 sm:$0xff]  }
  0xda   :  { %1851 = vmatpush2.bf16.msra.mxu0 %v3121_v5  ;;  %v3219_v5 = vld [vmem:[#allocation7 + $0x56c] ss:$16 sps:$4 sm:$0xff]  }
  0xdb   :  { %1892 = vmatpush2.bf16.msra.mxu1 %v3124_v6  ;;  %1852 = vmatprep.subr.bf16.mxu0 %v3129_v9  ;;  %v3222_v6 = vld [vmem:[#allocation7 + $0x76c] ss:$16 sps:$4 sm:$0xff]   ;;  %v3217_v9 = vld [vmem:[#allocation7 + $0x568] ss:$16 sps:$4 sm:$0xff]  }
  0xdc   :  { %1893 = vmatprep.subr.bf16.mxu1 %v3132_v10  ;;  %v3220_v10 = vld [vmem:[#allocation7 + $0x768] ss:$16 sps:$4 sm:$0xff]  }
  0xde   :  { %1853 = vmatpush2.bf16.msra.mxu0 %v3127_v11  ;;  %v3225_v11 = vld [vmem:[#allocation7 + $0x54c] ss:$16 sps:$4 sm:$0xff]  }
  0xdf   :  { %1894 = vmatpush2.bf16.msra.mxu1 %v3130_v12  ;;  %1854 = vmatprep.subr.bf16.mxu0 %v3135_v13  ;;  %v3228_v12 = vld [vmem:[#allocation7 + $0x74c] ss:$16 sps:$4 sm:$0xff]   ;;  %v3223_v13 = vld [vmem:[#allocation7 + $0x548] ss:$16 sps:$4 sm:$0xff]  }
  0xe0   :  { %1895 = vmatprep.subr.bf16.mxu1 %v3138_v14  ;;  %v3226_v14 = vld [vmem:[#allocation7 + $0x748] ss:$16 sps:$4 sm:$0xff]  }
  0xe2   :  { %1855 = vmatpush2.bf16.msra.mxu0 %v3133_v15  ;;  %v3231_v15 = vld [vmem:[#allocation7 + $0x52c] ss:$16 sps:$4 sm:$0xff]  }
  0xe3   :  { %1896 = vmatpush2.bf16.msra.mxu1 %v3136_v16  ;;  %1856 = vmatprep.subr.bf16.mxu0 %v3141_v19  ;;  %v3234_v16 = vld [vmem:[#allocation7 + $0x72c] ss:$16 sps:$4 sm:$0xff]   ;;  %v3229_v19 = vld [vmem:[#allocation7 + $0x528] ss:$16 sps:$4 sm:$0xff]  }
  0xe4   :  { %1897 = vmatprep.subr.bf16.mxu1 %v3144_v20  ;;  %v3232_v20 = vld [vmem:[#allocation7 + $0x728] ss:$16 sps:$4 sm:$0xff]  }
  0xe6   :  { %1857 = vmatpush2.bf16.msra.mxu0 %v3139_v21  ;;  %v3237_v21 = vld [vmem:[#allocation7 + $0x50c] ss:$16 sps:$4 sm:$0xff]  }
  0xe7   :  { %1898 = vmatpush2.bf16.msra.mxu1 %v3142_v22  ;;  %1908 = vmatprep.subr.bf16.mxu0 %v3147_v23  ;;  %v3240_v22 = vld [vmem:[#allocation7 + $0x70c] ss:$16 sps:$4 sm:$0xff]   ;;  %v3235_v23 = vld [vmem:[#allocation7 + $0x508] ss:$16 sps:$4 sm:$0xff]  }
  0xe8   :  { %1949 = vmatprep.subr.bf16.mxu1 %v3150_v24  ;;  %v3238_v24 = vld [vmem:[#allocation7 + $0x708] ss:$16 sps:$4 sm:$0xff]  }
  0xe9   :  { %1859 = vmatmul.mubr.bf16.vlgmr.msra.gmra.mxu0 %v3411_v7  ;;  %v3168_v7 = vld [vmem:[#allocation7 + $0x68c] ss:$16 sps:$4 sm:$0xff]  }
  0xea   :  { %1900 = vmatmul.mubr.bf16.vlgmr.msra.gmra.mxu1 %v3413_v8  ;;  %1909 = vmatpush1.bf16.msra.mxu0 %v3145_v25  ;;  %v3163_v8 = vld [vmem:[#allocation7 + $0x488] ss:$16 sps:$4 sm:$0xff]  }
  0xeb   :  { %1950 = vmatpush1.bf16.msra.mxu1 %v3148_v26  ;;  %1910 = vmatprep.subr.bf16.mxu0 %v3153_v27  ;;  %v3241_v25 = vld [vmem:[#allocation9 + $0x78] sm:$0xff]   ;;  %v3243_v27 = vld [vmem:[#allocation9 + $0x70] sm:$0xff]  }
  0xec   :  { %1951 = vmatprep.subr.bf16.mxu1 %v3156_v28  ;;  %1940 = vmatprep.mubr.bf16.mxu0 %v3423_v37  ;;  %v3169_v37 = vld [vmem:[#allocation7 + $0x468] ss:$16 sps:$4 sm:$0xff]  }
  0xed   :  { %1981 = vmatprep.mubr.bf16.mxu1 %v3427_v38  ;;  %v3172_v38 = vld [vmem:[#allocation7 + $0x668] ss:$16 sps:$4 sm:$0xff]  }
  0xee   :  { %1911 = vmatpush1.bf16.msra.mxu0 %v3151_v29  ;;  %v3242_v26 = vld [vmem:[#allocation9 + $0x38] sm:$0xff]  }
  0xef   :  { %1952 = vmatpush1.bf16.msra.mxu1 %v3154_v30  ;;  %1912 = vmatprep.subr.bf16.mxu0 %v3159_v31  ;;  %v3244_v30 = vld [vmem:[#allocation9 + $0x30] sm:$0xff]  }
  0xf0   :  { %1953 = vmatprep.subr.bf16.mxu1 %v3162_v32 }
  0xf2   :  { %1913 = vmatpush1.bf16.msra.mxu0 %v3157_v33  ;;  %v3245_v33 = vld [vmem:[#allocation9 + $0x68] sm:$0xff]  }
  0xf3   :  { %1954 = vmatpush1.bf16.msra.mxu1 %v3160_v34  ;;  %1914 = vmatprep.subr.bf16.mxu0 %v3165_v35 }
  0xf4   :  { %1955 = vmatprep.subr.bf16.mxu1 %v3168_v7  ;;  %v3246_v7 = vld [vmem:[#allocation9 + $0x28] sm:$0xff]  }
  0xf6   :  { %1915 = vmatpush1.bf16.msra.mxu0 %v3163_v8  ;;  %v3247_v8 = vld [vmem:[#allocation9 + $0x60] sm:$0xff]  }
  0xf7   :  { %1956 = vmatpush1.bf16.msra.mxu1 %v3166_v48  ;;  %1916 = vmatprep.subr.bf16.mxu0 %v3171_v52 }
  0xf8   :  { %1957 = vmatprep.subr.bf16.mxu1 %v3174_v36  ;;  %v3257_v36 = vld [vmem:[#allocation9 + $0xf8] sm:$0xff]  }
  0xfa   :  { %1917 = vmatpush1.bf16.msra.mxu0 %v3169_v37  ;;  %v3259_v37 = vld [vmem:[#allocation9 + $0xf0] sm:$0xff]  }
  0xfb   :  { %1958 = vmatpush1.bf16.msra.mxu1 %v3172_v38  ;;  %1918 = vmatprep.subr.bf16.mxu0 %v3177_v39  ;;  %v3260_v38 = vld [vmem:[#allocation9 + $0xb0] sm:$0xff]   ;;  %v3249_v39 = vld [vmem:[#allocation9 + $0x58] sm:$0xff]  }
  0xfc   :  { %1959 = vmatprep.subr.bf16.mxu1 %v3180_v40  ;;  %v3261_v40 = vld [vmem:[#allocation9 + $0xe8] sm:$0xff]  }
  0xfe   :  { %1919 = vmatpush1.bf16.msra.mxu0 %v3175_v41  ;;  %v334_v41 = vlaneseq }
  0xff   :  { %1960 = vmatpush1.bf16.msra.mxu1 %v3178_v42  ;;  %1920 = vmatprep.subr.bf16.mxu0 %v3183_v43  ;;  %v3250_v43 = vld [vmem:[#allocation9 + $0x18] sm:$0xff]  }
 0x100   :  { %1961 = vmatprep.subr.bf16.mxu1 %v3186_v44  ;;  %v3457_v42 = vand.u32 127, %v334_v41  ;;  %v3262_v44 = vld [vmem:[#allocation9 + $0xa8] sm:$0xff]  }
 0x102   :  { %1921 = vmatpush1.bf16.msra.mxu0 %v3181_v45  ;;  %v3251_v45 = vld [vmem:[#allocation9 + $0x50] sm:$0xff]  }
 0x103   :  { %1962 = vmatpush1.bf16.msra.mxu1 %v3184_v46  ;;  %1922 = vmatprep.subr.bf16.mxu0 %v3189_v47  ;;  %v3263_v46 = vld [vmem:[#allocation9 + $0xe0] sm:$0xff]   ;;  %v3459_v47 = vshrl.u32 %v334_v41, 7 }
 0x104   :  { %1963 = vmatprep.subr.bf16.mxu1 %v3192_v49  ;;  %v3252_v49 = vld [vmem:[#allocation9 + $0x10] sm:$0xff]  }
 0x106   :  { %1923 = vmatpush1.bf16.msra.mxu0 %v3187_v50  ;;  %v2000_v50 = vadd.s32 128, %v3457_v42 }
 0x107   :  { %1964 = vmatpush1.bf16.msra.mxu1 %v3190_v51  ;;  %1924 = vmatprep.subr.bf16.mxu0 %v3195_v53  ;;  %v3463_v51 = vmul.u32 512, %v3459_v47  ;;  %v3264_v53 = vld [vmem:[#allocation9 + $0xa0] sm:$0xff]  }
 0x108   :  { %1965 = vmatprep.subr.bf16.mxu1 %v3198_v54  ;;  %v3253_v54 = vld [vmem:[#allocation9 + $0x48] sm:$0xff]  }
 0x10a   :  { %1925 = vmatpush2.bf16.msra.mxu0 %v3193_v55  ;;  %v3265_v55 = vld [vmem:[#allocation9 + $0xd8] sm:$0xff]  }
 0x10b   :  { %1966 = vmatpush2.bf16.msra.mxu1 %v3196_v56  ;;  %1926 = vmatprep.subr.bf16.mxu0 %v3201_v57  ;;  %v3254_v56 = vld [vmem:[#allocation9 + $0x8] sm:$0xff]   ;;  %v2005_v57 = vadd.s32 %v3463_v51, %v2000_v50 }
 0x10c   :  { %1967 = vmatprep.subr.bf16.mxu1 %v3204_v58  ;;  %v3266_v58 = vld [vmem:[#allocation9 + $0x98] sm:$0xff]  }
 0x10e   :  { %1927 = vmatpush2.bf16.msra.mxu0 %v3199_v59  ;;  %v3255_v59 = vld [vmem:[#allocation9 + $0x40] sm:$0xff]  }
 0x10f   :  { %1968 = vmatpush2.bf16.msra.mxu1 %v3202_v60  ;;  %1928 = vmatprep.subr.bf16.mxu0 %v3207_v61  ;;  %v2004_v60 = vadd.s32 %v3463_v51, %v3457_v42  ;;  %v3256_v61 = vld [vmem:[#allocation9] sm:$0xff]  }
 0x110   :  { %1969 = vmatprep.subr.bf16.mxu1 %v3210_v62  ;;  %v2009_v62 = vadd.s32 461845907, %v2005_v57 }
 0x112   :  { %1929 = vmatpush2.bf16.msra.mxu0 %v3205_v63  ;;  %v3471_v63 = vstv %s3517_s0 }
 0x113   :  { %1970 = vmatpush2.bf16.msra.mxu1 %v3208_v0  ;;  %1930 = vmatprep.subr.bf16.mxu0 %v3213_v1  ;;  %v2008_v0 = vadd.s32 461845907, %v2004_v60  ;;  %v2014_v1 = vxor.u32 %v3471_v63, %v2009_v62 }
 0x114   :  { %1971 = vmatprep.subr.bf16.mxu1 %v3216_v2 }
 0x115   :  { %v2013_v2 = vxor.u32 %v3471_v63, %v2008_v0 }
 0x116   :  { %1931 = vmatpush2.bf16.msra.mxu0 %v3211_v3  ;;  %v2736_v3 = vshrl.u32 %v2014_v1, 16 }
 0x117   :  { %1972 = vmatpush2.bf16.msra.mxu1 %v3214_v4  ;;  %1932 = vmatprep.subr.bf16.mxu0 %v3219_v5  ;;  %v2735_v4 = vshrl.u32 %v2013_v2, 16 }
 0x118   :  { %1973 = vmatprep.subr.bf16.mxu1 %v3222_v6  ;;  %v2026_v5 = vxor.u32 %v2736_v3, %v2014_v1  ;;  %v2002_v1 = vadd.s32 384, %v3457_v42 }
 0x119   :  { %v2025_v6 = vxor.u32 %v2735_v4, %v2013_v2  ;;  %v2001_v2 = vadd.s32 256, %v3457_v42 }
 0x11a   :  { %1933 = vmatpush2.bf16.msra.mxu0 %v3217_v9  ;;  %v2030_v9 = vmul.u32 2246822507, %v2026_v5  ;;  %v2007_v3 = vadd.s32 %v3463_v51, %v2002_v1 }
 0x11b   :  { %1974 = vmatpush2.bf16.msra.mxu1 %v3220_v10  ;;  %1934 = vmatprep.subr.bf16.mxu0 %v3225_v11  ;;  %v2029_v10 = vmul.u32 2246822507, %v2025_v6  ;;  %v2006_v4 = vadd.s32 %v3463_v51, %v2001_v2  ;;  %v348_v51 = vsub.s32 3, %v3459_v47 }
 0x11c   :  { %1975 = vmatprep.subr.bf16.mxu1 %v3228_v12  ;;  %v2740_v11 = vshrl.u32 %v2030_v9, 13  ;;  %v2011_v5 = vadd.s32 461845907, %v2007_v3 }
 0x11d   :  { %v2739_v12 = vshrl.u32 %v2029_v10, 13  ;;  %v2010_v6 = vadd.s32 461845907, %v2006_v4 }
 0x11e   :  { %1935 = vmatpush2.bf16.msra.mxu0 %v3223_v13  ;;  %v2042_v13 = vxor.u32 %v2740_v11, %v2030_v9  ;;  %v2016_v9 = vxor.u32 %v3471_v63, %v2011_v5 }
 0x11f   :  { %1976 = vmatpush2.bf16.msra.mxu1 %v3226_v14  ;;  %1936 = vmatprep.subr.bf16.mxu0 %v3231_v15  ;;  %v2041_v14 = vxor.u32 %v2739_v12, %v2029_v10  ;;  %v336_v15 = vsub.s32 0, %v3459_v47  ;;  %v2015_v10 = vxor.u32 %v3471_v63, %v2010_v6 }
 0x120   :  { %1977 = vmatprep.subr.bf16.mxu1 %v3234_v16  ;;  %v3479_v16 = vld [vmem:[%s3520_s3] sm:$0xf]  ;;  %v2738_v11 = vshrl.u32 %v2016_v9, 16 }
 0x121   :  { %v2737_v12 = vshrl.u32 %v2015_v10, 16 }
 0x122   :  { %1937 = vmatpush2.bf16.msra.mxu0 %v3229_v19  ;;  %v340_v19 = vsub.s32 1, %v3459_v47 }
 0x123   :  { %1978 = vmatpush2.bf16.msra.mxu1 %v3232_v20  ;;  %1938 = vmatprep.subr.bf16.mxu0 %v3237_v21  ;;  %v2046_v20 = vmul.u32 3266489909, %v2042_v13  ;;  %v2045_v21 = vmul.u32 3266489909, %v2041_v14  ;;  %v2028_v13 = vxor.u32 %v2738_v11, %v2016_v9  ;;  %v2027_v14 = vxor.u32 %v2737_v12, %v2015_v10  ;;  %v2747_v9 = vld [vmem:[%s3522_s5] ss:$0 sm:$0xff] }
 0x124   :  { %1979 = vmatprep.subr.bf16.mxu1 %v3240_v22  ;;  %v337_v22 = vrot.slane %v3479_v16, %v336_v15 }
 0x125   :  { %v2032_v15 = vmul.u32 2246822507, %v2028_v13 }
 0x126   :  { %1939 = vmatpush2.bf16.msra.mxu0 %v3235_v23  ;;  %v341_v23 = vrot.slane %v3479_v16, %v340_v19  ;;  %v2031_v19 = vmul.u32 2246822507, %v2027_v14 }
 0x127   :  { %1980 = vmatpush2.bf16.msra.mxu1 %v3238_v24  ;;  %2798 = vmatprep.subr.bf16.mxu0 %v3241_v25  ;;  %v2744_v24 = vshrl.u32 %v2046_v20, 16  ;;  %v2743_v25 = vshrl.u32 %v2045_v21, 16 }
 0x128   :  { %2820 = vmatprep.subr.bf16.mxu1 %v3257_v36 }
 0x129   :  { %v3447_v28 = vpop.f32.mrf.mxu0  ;;  %1941 = vmatmul.mubr.bf16.vlgmr.msra.gmra.mxu0 %v3433_v17  ;;  %v3258_v17 = vld [vmem:[#allocation9 + $0xb8] sm:$0xff]  }
 0x12a   :  { %v3449_v29 = vpop.f32.mrf.mxu1  ;;  %1982 = vmatmul.mubr.bf16.vlgmr.msra.gmra.mxu1 %v3437_v18  ;;  %2799 = vmatpush3.bf16.msra.mxu0 %v3242_v26  ;;  %v3248_v18 = vld [vmem:[#allocation9 + $0x20] sm:$0xff]   ;;  %v1697_v26 = vadd.f32 %v3447_v28, %v337_v22  ;;  %v3269_v28 = vld [vmem:[#allocation9 + $0xc8] sm:$0xff]  }
 0x12b   :  { %v3453_v31 = vpop.f32.mrf.mxu0  ;;  %2800 = vmatprep.subr.bf16.mxu0 %v3243_v27  ;;  %2821 = vmatpush3.bf16.msra.mxu1 %v3258_v17 }
 0x12c   :  { %v3455_v32 = vpop.f32.mrf.mxu1  ;;  %2822 = vmatprep.subr.bf16.mxu1 %v3259_v37  ;;  %v1699_v27 = vadd.f32 %v3453_v31, %v341_v23 }
 0x12d   :  { %v1700_v34 = vpop.f32.mrf.mxu0 }
 0x12e   :  { %v1741_v35 = vpop.f32.mrf.mxu1  ;;  %2801 = vmatpush3.bf16.msra.mxu0 %v3244_v30  ;;  %v2058_v30 = vxor.u32 %v2744_v24, %v2046_v20  ;;  %v3267_v34 = vld [vmem:[#allocation9 + $0xd0] sm:$0xff]   ;;  %v2742_v20 = vshrl.u32 %v2032_v15, 13  ;;  %v344_v24 = vsub.s32 2, %v3459_v47 }
 0x12f   :  { %v1701_v48 = vpop.f32.mrf.mxu0  ;;  %2802 = vmatprep.subr.bf16.mxu0 %v3245_v33  ;;  %2823 = vmatpush3.bf16.msra.mxu1 %v3260_v38  ;;  %v2057_v33 = vxor.u32 %v2743_v25, %v2045_v21  ;;  %v1738_v35 = vadd.f32 %v3449_v29, %v1697_v26  ;;  %v2741_v21 = vshrl.u32 %v2031_v19, 13 }
 0x130   :  { %v1742_v52 = vpop.f32.mrf.mxu1  ;;  %2824 = vmatprep.subr.bf16.mxu1 %v3261_v40  ;;  %v2062_v17 = vand.u32 2147483647, %v2058_v30  ;;  %v3270_v40 = vld [vmem:[#allocation9 + $0x88] sm:$0xff]   ;;  %v2044_v22 = vxor.u32 %v2742_v20, %v2032_v15  ;;  %v349_v30 = vrot.slane %v3479_v16, %v348_v51 }
 0x131   :  { %v1740_v52 = vadd.f32 %v3455_v32, %v1699_v27  ;;  %v2061_v38 = vand.u32 2147483647, %v2057_v33  ;;  %v2043_v23 = vxor.u32 %v2741_v21, %v2031_v19  ;;  %v345_v27 = vrot.slane %v3479_v16, %v344_v24  ;;  %v2795_v19 = vld [vmem:[%s3523_s6] ss:$0 sm:$0xff] }
 0x132   :  { %2803 = vmatpush3.bf16.msra.mxu0 %v3246_v7  ;;  %v3268_v7 = vld [vmem:[#allocation9 + $0x90] sm:$0xff]   ;;  %vm3488_vm0 = vcmp.ge.s32.totalorder %v2062_v17, 858993459  ;;  %v2048_v25 = vmul.u32 3266489909, %v2044_v22 }
 0x133   :  { %2804 = vmatprep.subr.bf16.mxu0 %v3247_v8  ;;  %2825 = vmatpush3.bf16.msra.mxu1 %v3262_v44  ;;  %vm2065_vm1 = vcmp.ge.s32.totalorder %v2061_v38, 858993459  ;;  %vm2780_vm2 = vmpackc.low %vm3488_vm0, %vm3488_vm0  ;;  %v2047_v26 = vmul.u32 3266489909, %v2043_v23  ;;  %v2796_v22 = vld [vmem:[#allocation4] ss:$0 sm:$0xff] }
 0x134   :  { %2826 = vmatprep.subr.bf16.mxu1 %v3263_v46  ;;  %vm2783_vm3 = vmpackc.low %vm2065_vm1, %vm2065_vm1  ;;  %v2746_v33 = vshrl.u32 %v2048_v25, 16 }
 0x136   :  { %2805 = vmatpush3.bf16.msra.mxu0 %v3248_v18 }
 0x137   :  { %2806 = vmatprep.subr.bf16.mxu0 %v3249_v39  ;;  %2827 = vmatpush3.bf16.msra.mxu1 %v3264_v53  ;;  %v3272_v53 = vld [vmem:[#allocation9 + $0x80] sm:$0xff]  }
 0x138   :  { %2828 = vmatprep.subr.bf16.mxu1 %v3265_v55 }
 0x13a   :  { %2807 = vmatpush3.bf16.msra.mxu0 %v3250_v43 }
 0x13b   :  { %2808 = vmatprep.subr.bf16.mxu0 %v3251_v45  ;;  %2829 = vmatpush3.bf16.msra.mxu1 %v3266_v58 }
 0x13c   :  { %2830 = vmatprep.subr.bf16.mxu1 %v3267_v34  ;;  %v2745_v34 = vshrl.u32 %v2047_v26, 16 }
 0x13e   :  { %2809 = vmatpush3.bf16.msra.mxu0 %v3252_v49  ;;  %v3271_v49 = vld [vmem:[#allocation9 + $0xc0] sm:$0xff]  }
 0x13f   :  { %2810 = vmatprep.subr.bf16.mxu0 %v3253_v54  ;;  %2831 = vmatpush3.bf16.msra.mxu1 %v3268_v7 }
 0x140   :  { %2832 = vmatprep.subr.bf16.mxu1 %v3269_v28 }
 0x142   :  { %2811 = vmatpush3.bf16.msra.mxu0 %v3254_v56 }
 0x143   :  { %2812 = vmatprep.subr.bf16.mxu0 %v3255_v59  ;;  %2833 = vmatpush3.bf16.msra.mxu1 %v3270_v40 }
 0x144   :  { %2834 = vmatprep.subr.bf16.mxu1 %v3271_v49 }
 0x146   :  { %2813 = vmatpush3.bf16.msra.mxu0 %v3256_v61 }
 0x147   :  { %2835 = vmatpush3.bf16.msra.mxu1 %v3272_v53 }
 0x169   :  { %v1778_v8 = vpop.f32.mrf.mxu0 }
 0x16a   :  { %v1819_v48 = vpop.f32.mrf.mxu1  ;;  %v1779_v36 = vadd.f32 %v1778_v8, %v1738_v35  ;;  %v2060_v8 = vxor.u32 %v2746_v33, %v2048_v25 }
 0x16b   :  { %v1780_v37 = vpop.f32.mrf.mxu0 }
 0x16c   :  { %v1821_v18 = vpop.f32.mrf.mxu1  ;;  %v1820_v39 = vadd.f32 %v1819_v48, %v1779_v36  ;;  %v1781_v31 = vadd.f32 %v1780_v37, %v1740_v52  ;;  %v2059_v48 = vxor.u32 %v2745_v34, %v2047_v26  ;;  %v2064_v38 = vand.u32 2147483647, %v2060_v8 }
 0x16d   :  { %v1782_v41 = vpop.f32.mrf.mxu0 }
 0x16e   :  { %v1823_v43 = vpop.f32.mrf.mxu1  ;;  %v1822_v29 = vadd.f32 %v1821_v18, %v1781_v31  ;;  %v1990_v32 = vmax.f32 %v1820_v39, 0.0  ;;  %v2063_v31 = vand.u32 2147483647, %v2059_v48  ;;  %vm2068_vm4 = vcmp.ge.s32.totalorder %v2064_v38, 858993459 }
 0x16f   :  { %v1783_v45 = vpop.f32.mrf.mxu0  ;;  %vm2786_vm6 = vmpackc.low %vm2068_vm4, %vm2068_vm4 }
 0x170   :  { %v1824_v46 = vpop.f32.mrf.mxu1  ;;  %v1991_v50 = vmax.f32 %v1822_v29, 0.0  ;;  %v2784_v55 = vpack.c.bf16 %v1990_v32, %v1990_v32  ;;  %vm2067_vm5 = vcmp.ge.s32.totalorder %v2063_v31, 858993459 }
 0x171   :  { %vm2789_vm7 = vmpackc.low %vm2067_vm5, %vm2067_vm5 }
 0x172   :  { %v2781_v54 = vpack.c.bf16 %v1991_v50, %v1991_v50 }
 0x174   :  { %2782 = vmatprep.mubr.msk.bf16.mxu0 %vm2780_vm2, %v2781_v54 }
 0x175   :  { %2785 = vmatmul.mubr.msk.bf16.vlgmr.msra.gmra.mxu0 %vm2783_vm3, %v2784_v55 }
 0x1a9   :  { %v1860_v56 = vpop.f32.mrf.mxu0 }
 0x1aa   :  { %v1901_v57 = vpop.f32.mrf.mxu1  ;;  %v1861_v35 = vadd.f32 %v1860_v56, %v345_v27 }
 0x1ab   :  { %v1862_v58 = vpop.f32.mrf.mxu0 }
 0x1ac   :  { %v1903_v59 = vpop.f32.mrf.mxu1  ;;  %v1863_v7 = vadd.f32 %v1862_v58, %v349_v30  ;;  %v1902_v52 = vadd.f32 %v1901_v57, %v1861_v35  ;;  %v2421_v58 = vmul.u32 128, %v3459_v47 }
 0x1ad   :  { %v1864_v60 = vpop.f32.mrf.mxu0 }
 0x1ae   :  { %v1905_v61 = vpop.f32.mrf.mxu1  ;;  %v1904_v37 = vadd.f32 %v1903_v59, %v1863_v7  ;;  %v2422_v59 = vadd.s32 %v2421_v58, %v3457_v42 }
 0x1af   :  { %v1865_v62 = vpop.f32.mrf.mxu0 }
 0x1b0   :  { %v1906_v0 = vpop.f32.mrf.mxu1  ;;  %v2423_v60 = vadd.s32 1759714724, %v2422_v59 }
 0x1b2   :  { %v2424_v61 = vxor.u32 %v2423_v60, %v3471_v63 }
 0x1b4   :  { %v2792_v62 = vshrl.u32 %v2424_v61, 16 }
 0x1b6   :  { %v2427_v0 = vxor.u32 %v2792_v62, %v2424_v61 }
 0x1b8   :  { %v2428_v1 = vmul.u32 2246822507, %v2427_v0 }
 0x1ba   :  { %v2793_v2 = vshrl.u32 %v2428_v1, 13 }
 0x1bc   :  { %v2431_v3 = vxor.u32 %v2793_v2, %v2428_v1 }
 0x1be   :  { %v2432_v4 = vmul.u32 3266489909, %v2431_v3 }
 0x1c0   :  { %v2794_v5 = vshrl.u32 %v2432_v4, 16 }
 0x1c2   :  { %v2435_v6 = vxor.u32 %v2794_v5, %v2432_v4 }
 0x1c4   :  { %v2436_v47 = vand.u32 2147483647, %v2435_v6 }
 0x1c6   :  { %vm2437_vm8 = vcmp.ge.s32.totalorder %v2436_v47, 858993459 }
 0x1e9   :  { %v1942_v36 = vpop.f32.mrf.mxu0 }
 0x1ea   :  { %v1983_v17 = vpop.f32.mrf.mxu1  ;;  %v1943_v18 = vadd.f32 %v1942_v36, %v1902_v52 }
 0x1eb   :  { %v1944_v28 = vpop.f32.mrf.mxu0 }
 0x1ec   :  { %v1985_v39 = vpop.f32.mrf.mxu1  ;;  %v1984_v40 = vadd.f32 %v1983_v17, %v1943_v18  ;;  %v1945_v41 = vadd.f32 %v1944_v28, %v1904_v37 }
 0x1ed   :  { %v1946_v43 = vpop.f32.mrf.mxu0 }
 0x1ee   :  { %v1987_v29 = vpop.f32.mrf.mxu1  ;;  %v1986_v16 = vadd.f32 %v1985_v39, %v1945_v41  ;;  %v1992_v44 = vmax.f32 %v1984_v40, 0.0 }
 0x1ef   :  { %v1947_v32 = vpop.f32.mrf.mxu0 }
 0x1f0   :  { %v1988_v45 = vpop.f32.mrf.mxu1  ;;  %v1993_v46 = vmax.f32 %v1986_v16, 0.0  ;;  %v2790_v50 = vpack.c.bf16 %v1992_v44, %v1992_v44 }
 0x1f2   :  { %v2787_v49 = vpack.c.bf16 %v1993_v46, %v1993_v46 }
 0x1f4   :  { %2788 = vmatprep.mubr.msk.bf16.mxu1 %vm2786_vm6, %v2787_v49 }
 0x1f5   :  { %2791 = vmatmul.mubr.msk.bf16.vlgmr.msra.gmra.mxu1 %vm2789_vm7, %v2790_v50 }
 0x235   :  { %v2814_v53 = vpop.f32.mrf.mxu0 }
 0x237   :  { %v2815_v54 = vpop.f32.mrf.mxu0 }
 0x238   :  { %v2816_v55 = vadd.f32 %v2815_v54, %v2814_v53 }
 0x239   :  { %v2817_v56 = vpop.f32.mrf.mxu0 }
 0x23a   :  { %v2375_v12 = vadd.f32 %v2816_v55, %v2747_v9 }
 0x23b   :  { %v2818_v57 = vpop.f32.mrf.mxu0 }
 0x2b5   :  { %v2836_v10 = vpop.f32.mrf.mxu1 }
 0x2b7   :  { %v2837_v11 = vpop.f32.mrf.mxu1 }
 0x2b8   :  { %v2838_v42 = vadd.f32 %v2837_v11, %v2836_v10 }
 0x2b9   :  { %v2839_v13 = vpop.f32.mrf.mxu1 }
 0x2ba   :  { %v2415_v14 = vadd.f32 %v2838_v42, %v2375_v12 }
 0x2bb   :  { %v2840_v63 = vpop.f32.mrf.mxu1 }
 0x2bc   :  { %v2420_v15 = vmax.f32 %v2415_v14, 0.0 }
 0x2be   :  { %v2438_v20 = vsel %vm2437_vm8, %v2420_v15, 0.0 }
 0x2bf   :  { %v2446_v21 = vmul.f32 %v2795_v19, %v2438_v20 }
 0x2c1   :  { %2447 = vadd.xlane.f32.xlu0 %v2446_v21 }
 0x34a   :  { %v2448_v23 = vpop.xlane.xlu0 %2447 }
 0x34b   :  { %v2456_v24 = vadd.f32 %v2796_v22, %v2448_v23 }
 0x34d   :  { %v2797_v51 = vmul.f32 -1.442695, %v2456_v24 }
 0x34f   :  { %3273 = vpow2.f32 %v2797_v51 }
 0x35c   :  { %v3274_v25 = vpop.eup %3273 }
 0x35d   :  { %v2460_v26 = vadd.f32 1.0, %v3274_v25 }
 0x35f   :  { %3275 = vrcp.f32 %v2460_v26 }
 0x36c   :  { %v3276_v27 = vpop.eup %3275 }
 0x36d   :  { %2464 = vst.msk [vmem:[%s3525_s8] sm:$0xff] %vm2463_vm9, %v3276_v27 }
 0x36e   :  { %2469 = vsyncpa [#allocation6], 1 }
 0x36f   :  { %2470 = vsyncpa [#allocation8], 1 }

</bundles_post_ra>
